<compile_context>
chip_gen: v7x
topology: tpu7x:2x2x1
jax: 0.10.0
libtpu: 0.0.40
codegen_flags: <defaults>
</compile_context>

<pallas_src>
import functools

import numpy as np
import jax
import jax.numpy as jnp
from jax.experimental import pallas as pl
from jax.experimental.pallas import tpu as pltpu


def _pick_unroll(bb, h_dim, steps):
    """Unroll factor sized against vreg pressure (64 x 4 KiB vregs)."""
    vregs_per_step = 3 * max(1, (bb * h_dim) // 1024)
    return int(max(1, min(8, max(1, 48 // vregs_per_step), int(steps))))


def _weight_spec(shape, single_buffer):
    """BlockSpec for grid-constant blocks; single-buffered when supported."""
    index_map = lambda bi, ci, _n=len(shape): (0,) * _n
    if single_buffer and hasattr(pl, "Buffered"):
        try:
            return pl.BlockSpec(shape, index_map, pipeline_mode=pl.Buffered(1))
        except TypeError:
            pass
    return pl.BlockSpec(shape, index_map)


def _rnn_kernel(*refs, num_layers, chunk, nc, tail_steps, compute_dtype):
    """Processes one (batch_block, time_chunk) tile; all layers handled in-kernel."""
    if num_layers > 1:
        (x_ref, hx_ref, w_ih0_ref, w_ihr_ref, w_hh_ref, b_ref,
         y_ref, hn_ref, h_state, seq_buf) = refs
    else:
        (x_ref, hx_ref, w_ih0_ref, w_hh_ref, b_ref,
         y_ref, hn_ref, h_state) = refs
        w_ihr_ref = None
        seq_buf = None

    ci = pl.program_id(1)              # time-chunk index (sequential / "arbitrary" axis)
    bb = x_ref.shape[1]                # padded batch rows in this block
    h_dim = w_hh_ref.shape[-1]         # padded hidden size
    # Interleave two independent batch sub-recurrences to hide MXU/EUP latency on the
    # serial chain (only when each half stays sublane-aligned).
    split = (bb >= 16) and (bb % 16 == 0)
    half = bb // 2

    # Load the initial hidden state once per batch block (first time chunk).
    @pl.when(ci == 0)
    def _():
        h_state[...] = hx_ref[...]

    def run_chunk(steps):
        unroll = _pick_unroll(bb, h_dim, steps)
        for layer in range(num_layers):
            # Top layer writes straight into the output block (no final bulk copy).
            buf = y_ref if layer == num_layers - 1 else seq_buf

            # ---- hoisted input projection: one large MXU matmul per layer / chunk ----
            if layer == 0:
                inp = x_ref[...].reshape(chunk * bb, x_ref.shape[-1])
                w_ih = w_ih0_ref[...]
            else:
                inp = seq_buf[...].astype(compute_dtype).reshape(chunk * bb, h_dim)
                w_ih = w_ihr_ref[layer - 1]
            pre = jnp.dot(inp, w_ih, preferred_element_type=jnp.float32) + b_ref[layer]
            buf[...] = pre.reshape(chunk, bb, h_dim).astype(buf.dtype)

            # Recurrent weights hoisted out of the serial time loop.
            w_hh = w_hh_ref[layer]
            # TODO(synk): replace the per-step jnp.dot with MXU-resident
            # pltpu.matmul_push_rhs / matmul_acc_lhs / matmul_pop.

            if split:
                def step(t, carry):
                    ha, hb = carry
                    da = jnp.dot(ha.astype(compute_dtype), w_hh,
                                 preferred_element_type=jnp.float32)
                    db = jnp.dot(hb.astype(compute_dtype), w_hh,
                                 preferred_element_type=jnp.float32)
                    ha = jnp.tanh(buf[t, :half].astype(jnp.float32) + da)
                    hb = jnp.tanh(buf[t, half:].astype(jnp.float32) + db)
                    buf[t, :half] = ha.astype(buf.dtype)
                    buf[t, half:] = hb.astype(buf.dtype)
                    return (ha, hb)

                ha, hb = jax.lax.fori_loop(
                    0, steps, step,
                    (h_state[layer, :half], h_state[layer, half:]), unroll=unroll)
                h_state[layer, :half] = ha
                h_state[layer, half:] = hb
                hn_ref[layer, :half] = ha
                hn_ref[layer, half:] = hb
            else:
                def step(t, h):
                    h = jnp.tanh(buf[t].astype(jnp.float32)
                                 + jnp.dot(h.astype(compute_dtype), w_hh,
                                           preferred_element_type=jnp.float32))
                    buf[t] = h.astype(buf.dtype)
                    return h

                h_last = jax.lax.fori_loop(0, steps, step, h_state[layer],
                                           unroll=unroll)
                h_state[layer] = h_last
                hn_ref[layer] = h_last

    # Full chunks run unmasked; only the last (partial) chunk runs a shorter loop,
    # so h_n stays correct for any T without a per-step mask on the serial chain.
    if tail_steps == chunk:
        run_chunk(chunk)
    else:
        @pl.when(ci < nc - 1)
        def _():
            run_chunk(chunk)

        @pl.when(ci == nc - 1)
        def _():
            run_chunk(tail_steps)


def affine_rnn_forward(inputs, hx, params, *, chunk=128, batch_block=None,
                       compute_dtype=jnp.float32):
    """Pallas forward.  Returns (output (B,T,H), h_n (L,B,H)) like the PyTorch module.

    `params` is a list of per-layer matrices shaped (in_size_l + H + 1, H) with rows
    [w_ih; w_hh; bias], exactly like the module's param{l}.
    """
    inputs = jnp.asarray(inputs, jnp.float32)
    hx = jnp.asarray(hx, jnp.float32)
    B, T, I = inputs.shape
    L, _, H = hx.shape
    assert len(params) == L

    cd = jnp.dtype(compute_dtype)
    wbytes = cd.itemsize
    buf_dtype = cd if cd == jnp.dtype(jnp.bfloat16) else jnp.dtype(jnp.float32)
    buf_bytes = jnp.dtype(buf_dtype).itemsize
    H_pad = 128 * int(pl.cdiv(H, 128))
    I_pad = 128 * int(pl.cdiv(I, 128))
    b_mult = 16 if cd == jnp.dtype(jnp.bfloat16) else 8

    B_ceil = b_mult * int(pl.cdiv(B, b_mult))
    if batch_block is None:
        batch_block = min(128, B_ceil)      # cap; large batches shard over the parallel axis
    batch_block = b_mult * int(pl.cdiv(min(int(batch_block), B_ceil), b_mult))
    chunk = int(max(1, min(int(chunk), T)))

    def vmem_estimate(ck, bb):
        est = 2 * ck * bb * I_pad * wbytes                     # x blocks (double-buffered)
        est += 2 * ck * bb * H_pad * 4                         # y blocks
        est += 4 * L * bb * H_pad * 4                          # hx + hn blocks
        est += 2 * (I_pad * H_pad + (2 * L - 1) * H_pad * H_pad) * wbytes  # weights
        est += 2 * L * 8 * H_pad * 4                           # bias (sublane-padded)
        est += L * bb * H_pad * 4                              # carried hidden scratch
        if L > 1:
            est += ck * bb * H_pad * buf_bytes                 # per-layer chunk buffer
        return est

    # Generation-aware VMEM plan: shrink chunk, then batch_block, until the plan fits.
    vmem_cap = 64 << 20                                        # v7x-safe default
    if hasattr(pltpu, "get_tpu_info"):
        try:
            vmem_cap = int(pltpu.get_tpu_info().vmem_capacity_bytes)
        except Exception:
            pass
    budget = int(vmem_cap * 0.72)
    while vmem_estimate(chunk, batch_block) > budget and chunk > 1:
        chunk = max(1, chunk // 2)
    while vmem_estimate(chunk, batch_block) > budget and batch_block > b_mult:
        batch_block = max(b_mult, b_mult * int(pl.cdiv(batch_block // 2, b_mult)))

    B_pad = batch_block * int(pl.cdiv(B, batch_block))
    T_pad = chunk * int(pl.cdiv(T, chunk))
    nb = B_pad // batch_block
    nc = T_pad // chunk
    tail_steps = T - (nc - 1) * chunk

    # ---- pad + relayout (time-major); padded weight rows/cols are zero so padded
    #      hidden lanes stay exactly 0 through tanh. ----
    x_pad = jnp.pad(jnp.transpose(inputs, (1, 0, 2)).astype(cd),
                    ((0, T_pad - T), (0, B_pad - B), (0, I_pad - I)))
    hx_pad = jnp.pad(hx, ((0, 0), (0, B_pad - B), (0, H_pad - H)))

    p0 = jnp.asarray(params[0], jnp.float32)
    w_ih0 = jnp.pad(p0[:I].astype(cd), ((0, I_pad - I), (0, H_pad - H)))
    w_hh_list, bias_list, w_ihr_list = [], [], []
    for l in range(L):
        p = jnp.asarray(params[l], jnp.float32)
        in_l = I if l == 0 else H
        if l > 0:
            w_ihr_list.append(jnp.pad(p[:H].astype(cd),
                                      ((0, H_pad - H), (0, H_pad - H))))
        w_hh_list.append(jnp.pad(p[in_l:in_l + H].astype(cd),
                                 ((0, H_pad - H), (0, H_pad - H))))
        bias_list.append(jnp.pad(p[in_l + H:in_l + H + 1],
                                 ((0, 0), (0, H_pad - H))))
    w_hh = jnp.stack(w_hh_list)                   # (L, H_pad, H_pad)
    bias = jnp.stack(bias_list)                   # (L, 1, H_pad) f32
    w_ihr = jnp.stack(w_ihr_list) if L > 1 else None

    est = vmem_estimate(chunk, batch_block)
    vmem_limit = None
    if est > (24 << 20):
        vmem_limit = int(min(max(est + (8 << 20), 32 << 20), int(vmem_cap * 0.9)))

    kernel = functools.partial(_rnn_kernel, num_layers=L, chunk=chunk, nc=nc,
                               tail_steps=tail_steps, compute_dtype=cd)

    scratch = [pltpu.VMEM((L, batch_block, H_pad), jnp.float32)]   # carried hidden state
    if L > 1:
        scratch.append(pltpu.VMEM((chunk, batch_block, H_pad), buf_dtype))  # layer buffer

    args = [x_pad, hx_pad, w_ih0]
    if L > 1:
        args.append(w_ihr)
    args += [w_hh, bias]

    out_shape = (jax.ShapeDtypeStruct((T_pad, B_pad, H_pad), jnp.float32),
                 jax.ShapeDtypeStruct((L, B_pad, H_pad), jnp.float32))

    def run(single_buffer_weights):
        in_specs = [
            pl.BlockSpec((chunk, batch_block, I_pad), lambda bi, ci: (ci, bi, 0)),
            pl.BlockSpec((L, batch_block, H_pad), lambda bi, ci: (0, bi, 0)),
            _weight_spec((I_pad, H_pad), single_buffer_weights),
        ]
        if L > 1:
            in_specs.append(_weight_spec((L - 1, H_pad, H_pad), single_buffer_weights))
        in_specs += [_weight_spec((L, H_pad, H_pad), single_buffer_weights),
                     _weight_spec((L, 1, H_pad), single_buffer_weights)]
        out_specs = (
            pl.BlockSpec((chunk, batch_block, H_pad), lambda bi, ci: (ci, bi, 0)),
            pl.BlockSpec((L, batch_block, H_pad), lambda bi, ci: (0, bi, 0)),
        )
        grid_spec = pltpu.PrefetchScalarGridSpec(
            num_scalar_prefetch=0, grid=(nb, nc),
            in_specs=in_specs, out_specs=out_specs, scratch_shapes=scratch)
        return pl.pallas_call(
            kernel, grid_spec=grid_spec, out_shape=out_shape,
            compiler_params=pltpu.CompilerParams(
                dimension_semantics=("parallel", "arbitrary"),
                vmem_limit_bytes=vmem_limit),
        )(*args)

    try:
        y_pad, hn_pad = run(True)
    except Exception:
        # Fallback if single-buffered (pipeline_mode=pl.Buffered(1)) constant blocks
        # are not supported by this jax / Mosaic version.
        y_pad, hn_pad = run(False)

    out = jnp.transpose(y_pad[:T, :B, :H], (1, 0, 2))   # back to (B, T, H)
    h_n = hn_pad[:, :B, :H]
    return out, h_n


def init_param(key, in_size, hidden):
    """Deterministic re-implementation of the module's rnn_weight_initialization."""
    std = (3.0 * (in_size + hidden)) ** -0.5
    w = jax.random.normal(key, (in_size + hidden, hidden), jnp.float32) * std
    q, _ = jnp.linalg.qr(w[in_size:])          # orthogonalize the recurrent block
    w = w.at[in_size:].set(q)
    b = jnp.zeros((1, hidden), jnp.float32)
    return jnp.concatenate([w, b], axis=0)     # (in_size + hidden + 1, hidden)


def rnn_reference_numpy(inputs, hx, params):
    """float64 numpy reference of the same affine-wrapped rnn_tanh semantics."""
    x = np.asarray(inputs, np.float64)
    hx = np.asarray(hx, np.float64)
    B, T, _ = x.shape
    L, _, H = hx.shape
    hn = []
    for layer in range(L):
        p = np.asarray(params[layer], np.float64)
        in_size = p.shape[0] - H - 1
        w_ih, w_hh, b = p[:in_size], p[in_size:in_size + H], p[in_size + H]
        h = hx[layer]
        outs = []
        for t in range(T):
            h = np.tanh(x[:, t] @ w_ih + h @ w_hh + b)
            outs.append(h)
        x = np.stack(outs, axis=1)
        hn.append(h)
    return x, np.stack(hn, axis=0)


def _run_case(key, batch, length, input_size, hidden_size, num_layers,
              chunk, compute_dtype, rtol, atol, batch_block=None):
    k_in, k_hx, k_p0, k_p1 = jax.random.split(key, 4)
    inputs = jax.random.normal(k_in, (batch, length, input_size), jnp.float32)
    hx = jax.random.normal(k_hx, (num_layers, batch, hidden_size), jnp.float32)
    params = [init_param(k_p0, input_size, hidden_size)]
    for l in range(1, num_layers):
        params.append(init_param(jax.random.fold_in(k_p1, l), hidden_size, hidden_size))

    out, h_n = jax.block_until_ready(
        affine_rnn_forward(inputs, hx, params, chunk=chunk, batch_block=batch_block,
                           compute_dtype=compute_dtype))

    ref_out, ref_hn = rnn_reference_numpy(inputs, hx, params)
    np.testing.assert_allclose(np.asarray(out), ref_out, rtol=rtol, atol=atol)
    np.testing.assert_allclose(np.asarray(h_n), ref_hn, rtol=rtol, atol=atol)


if __name__ == "__main__":
    key = jax.random.PRNGKey(0)
    k1, k2, k3, k4 = jax.random.split(key, 4)

    # Case 1: exact spec shapes (batch=1, length=1, input=3, hidden=5, 2 layers), f32.
    _run_case(k1, batch=1, length=1, input_size=3, hidden_size=5, num_layers=2,
              chunk=128, compute_dtype=jnp.float32, rtol=1e-3, atol=1e-3)

    # Case 2: single layer (no w_ihr / seq_buf), 2 batch blocks on the parallel axis,
    # and a partial tail chunk (T=10, chunk=4).
    _run_case(k2, batch=16, length=10, input_size=3, hidden_size=5, num_layers=1,
              chunk=4, compute_dtype=jnp.float32, rtol=1e-3, atol=1e-3, batch_block=8)

    # Case 3: split-interleaved recurrence path (batch block 16), multi-layer, tail chunk.
    _run_case(k3, batch=16, length=10, input_size=3, hidden_size=5, num_layers=2,
              chunk=4, compute_dtype=jnp.float32, rtol=1e-3, atol=1e-3)

    # Case 4: bf16 MXU path (f32 accumulation / f32 carried h, bf16 layer buffer).
    _run_case(k4, batch=2, length=10, input_size=3, hidden_size=5, num_layers=2,
              chunk=4, compute_dtype=jnp.bfloat16, rtol=4e-2, atol=4e-2)

    print("KERNEL_OK")
</pallas_src>

<mosaic_0001>
module attributes {stable_mosaic.version = 11 : i64} {
  func.func @_rnn_kernel(%arg0: i32, %arg1: i32, %arg2: memref<1x8x128xf32, #tpu.memory_space<vmem>>, %arg3: memref<2x8x128xf32, #tpu.memory_space<vmem>>, %arg4: memref<128x128xf32, #tpu.memory_space<vmem>>, %arg5: memref<1x128x128xf32, #tpu.memory_space<vmem>>, %arg6: memref<2x128x128xf32, #tpu.memory_space<vmem>>, %arg7: memref<2x1x128xf32, #tpu.memory_space<vmem>>, %arg8: memref<1x8x128xf32, #tpu.memory_space<vmem>>, %arg9: memref<2x8x128xf32, #tpu.memory_space<vmem>>, %arg10: memref<2x8x128xf32, #tpu.memory_space<vmem>>, %arg11: memref<1x8x128xf32, #tpu.memory_space<vmem>>) attributes {dimension_semantics = [#tpu.dimension_semantics<parallel>, #tpu.dimension_semantics<arbitrary>], iteration_bounds = array<i64: 1, 1>, scalar_prefetch = 0 : i64, scratch_operands = 2 : i64, tpu.core_type = #tpu.core_type<tc>, window_params = [{transform_indices = @transform_0, window_bounds = array<i64: 1, 8, 128>}, {transform_indices = @transform_1, window_bounds = array<i64: 2, 8, 128>}, {pipeline_mode = #tpu.pipeline_mode<synchronous>, transform_indices = @transform_2, window_bounds = array<i64: 128, 128>}, {pipeline_mode = #tpu.pipeline_mode<synchronous>, transform_indices = @transform_3, window_bounds = array<i64: 1, 128, 128>}, {pipeline_mode = #tpu.pipeline_mode<synchronous>, transform_indices = @transform_4, window_bounds = array<i64: 2, 128, 128>}, {pipeline_mode = #tpu.pipeline_mode<synchronous>, transform_indices = @transform_5, window_bounds = array<i64: 2, 1, 128>}, {transform_indices = @transform_6, window_bounds = array<i64: 1, 8, 128>}, {transform_indices = @transform_7, window_bounds = array<i64: 2, 8, 128>}]} {
    %c0_i32 = arith.constant 0 : i32
    %0 = arith.cmpi eq, %arg1, %c0_i32 : i32
    %1 = arith.extui %0 : i1 to i32
    %c0_i32_0 = arith.constant 0 : i32
    %2 = arith.cmpi ne, %1, %c0_i32_0 : i32
    scf.if %2 {
      %c0_60 = arith.constant 0 : index
      %c0_61 = arith.constant 0 : index
      %c0_62 = arith.constant 0 : index
      %64 = vector.load %arg3[%c0_60, %c0_61, %c0_62] : memref<2x8x128xf32, #tpu.memory_space<vmem>>, vector<2x8x128xf32>
      %c0_63 = arith.constant 0 : index
      %c0_64 = arith.constant 0 : index
      %c0_65 = arith.constant 0 : index
      %65 = vector.load %arg10[%c0_63, %c0_64, %c0_65] : memref<2x8x128xf32, #tpu.memory_space<vmem>>, vector<2x8x128xf32>
      tpu.vector_store %arg10[%c0_63, %c0_64, %c0_65], %64 {strides = array<i32>} : memref<2x8x128xf32, #tpu.memory_space<vmem>>, vector<2x8x128xf32>,
    } else {
    }
    %c0 = arith.constant 0 : index
    %c0_1 = arith.constant 0 : index
    %c0_2 = arith.constant 0 : index
    %3 = vector.load %arg2[%c0, %c0_1, %c0_2] : memref<1x8x128xf32, #tpu.memory_space<vmem>>, vector<1x8x128xf32>
    %4 = vector.shape_cast %3 : vector<1x8x128xf32> to vector<8x128xf32>
    %c0_3 = arith.constant 0 : index
    %c0_4 = arith.constant 0 : index
    %5 = vector.load %arg4[%c0_3, %c0_4] : memref<128x128xf32, #tpu.memory_space<vmem>>, vector<128x128xf32>
    %cst = arith.constant dense<0.000000e+00> : vector<8x128xf32>
    %6 = tpu.matmul %4, %5, %cst {dimension_numbers = #tpu.dot_dimension_numbers<[1], [0], [0], [1], [0, 0, 1, 1], [], []>} : vector<8x128xf32>, vector<128x128xf32>, vector<8x128xf32> -> vector<8x128xf32>
    %c0_5 = arith.constant 0 : index
    %c0_6 = arith.constant 0 : index
    %c0_7 = arith.constant 0 : index
    %7 = vector.load %arg7[%c0_5, %c0_6, %c0_7] : memref<2x1x128xf32, #tpu.memory_space<vmem>>, vector<1x1x128xf32>
    %8 = vector.shape_cast %7 : vector<1x1x128xf32> to vector<1x128xf32>
    %9 = vector.broadcast %8 : vector<1x128xf32> to vector<8x128xf32>
    %10 = arith.addf %6, %9 : vector<8x128xf32>
    %11 = vector.shape_cast %10 : vector<8x128xf32> to vector<1x8x128xf32>
    %c0_8 = arith.constant 0 : index
    %c0_9 = arith.constant 0 : index
    %c0_10 = arith.constant 0 : index
    %12 = vector.load %arg11[%c0_8, %c0_9, %c0_10] : memref<1x8x128xf32, #tpu.memory_space<vmem>>, vector<1x8x128xf32>
    tpu.vector_store %arg11[%c0_8, %c0_9, %c0_10], %11 {strides = array<i32>} : memref<1x8x128xf32, #tpu.memory_space<vmem>>, vector<1x8x128xf32>,
    %c0_11 = arith.constant 0 : index
    %c0_12 = arith.constant 0 : index
    %c0_13 = arith.constant 0 : index
    %13 = vector.load %arg6[%c0_11, %c0_12, %c0_13] : memref<2x128x128xf32, #tpu.memory_space<vmem>>, vector<1x128x128xf32>
    %14 = vector.shape_cast %13 : vector<1x128x128xf32> to vector<128x128xf32>
    %c0_14 = arith.constant 0 : index
    %c0_15 = arith.constant 0 : index
    %c0_16 = arith.constant 0 : index
    %15 = vector.load %arg10[%c0_14, %c0_15, %c0_16] : memref<2x8x128xf32, #tpu.memory_space<vmem>>, vector<1x8x128xf32>
    %16 = vector.shape_cast %15 : vector<1x8x128xf32> to vector<8x128xf32>
    %c0_i32_17 = arith.constant 0 : i32
    %17 = arith.index_cast %c0_i32_17 : i32 to index
    %c0_18 = arith.constant 0 : index
    %c0_19 = arith.constant 0 : index
    %18 = vector.load %arg11[%17, %c0_18, %c0_19] : memref<1x8x128xf32, #tpu.memory_space<vmem>>, vector<1x8x128xf32>
    %19 = vector.shape_cast %18 : vector<1x8x128xf32> to vector<8x128xf32>
    %cst_20 = arith.constant dense<0.000000e+00> : vector<8x128xf32>
    %20 = tpu.matmul %16, %14, %cst_20 {dimension_numbers = #tpu.dot_dimension_numbers<[1], [0], [0], [1], [0, 0, 1, 1], [], []>} : vector<8x128xf32>, vector<128x128xf32>, vector<8x128xf32> -> vector<8x128xf32>
    %21 = arith.addf %19, %20 : vector<8x128xf32>
    %22 = math.tanh %21 : vector<8x128xf32>
    %23 = arith.index_cast %c0_i32_17 : i32 to index
    %c0_21 = arith.constant 0 : index
    %c0_22 = arith.constant 0 : index
    %24 = vector.load %arg11[%23, %c0_21, %c0_22] : memref<1x8x128xf32, #tpu.memory_space<vmem>>, vector<1x8x128xf32>
    %25 = vector.shape_cast %24 : vector<1x8x128xf32> to vector<8x128xf32>
    %26 = vector.shape_cast %22 : vector<8x128xf32> to vector<1x8x128xf32>
    tpu.vector_store %arg11[%23, %c0_21, %c0_22], %26 {strides = array<i32>} : memref<1x8x128xf32, #tpu.memory_space<vmem>>, vector<1x8x128xf32>,
    %c1_i32 = arith.constant 1 : i32
    %c0_23 = arith.constant 0 : index
    %c0_24 = arith.constant 0 : index
    %c0_25 = arith.constant 0 : index
    %27 = vector.load %arg10[%c0_23, %c0_24, %c0_25] : memref<2x8x128xf32, #tpu.memory_space<vmem>>, vector<1x8x128xf32>
    %28 = vector.shape_cast %27 : vector<1x8x128xf32> to vector<8x128xf32>
    %29 = vector.shape_cast %22 : vector<8x128xf32> to vector<1x8x128xf32>
    tpu.vector_store %arg10[%c0_23, %c0_24, %c0_25], %29 {strides = array<i32>} : memref<2x8x128xf32, #tpu.memory_space<vmem>>, vector<1x8x128xf32>,
    %c0_26 = arith.constant 0 : index
    %c0_27 = arith.constant 0 : index
    %c0_28 = arith.constant 0 : index
    %30 = vector.load %arg9[%c0_26, %c0_27, %c0_28] : memref<2x8x128xf32, #tpu.memory_space<vmem>>, vector<1x8x128xf32>
    %31 = vector.shape_cast %30 : vector<1x8x128xf32> to vector<8x128xf32>
    %32 = vector.shape_cast %22 : vector<8x128xf32> to vector<1x8x128xf32>
    tpu.vector_store %arg9[%c0_26, %c0_27, %c0_28], %32 {strides = array<i32>} : memref<2x8x128xf32, #tpu.memory_space<vmem>>, vector<1x8x128xf32>,
    %c0_29 = arith.constant 0 : index
    %c0_30 = arith.constant 0 : index
    %c0_31 = arith.constant 0 : index
    %33 = vector.load %arg11[%c0_29, %c0_30, %c0_31] : memref<1x8x128xf32, #tpu.memory_space<vmem>>, vector<1x8x128xf32>
    %34 = vector.shape_cast %33 : vector<1x8x128xf32> to vector<8x128xf32>
    %c0_32 = arith.constant 0 : index
    %c0_33 = arith.constant 0 : index
    %c0_34 = arith.constant 0 : index
    %35 = vector.load %arg5[%c0_32, %c0_33, %c0_34] : memref<1x128x128xf32, #tpu.memory_space<vmem>>, vector<1x128x128xf32>
    %36 = vector.shape_cast %35 : vector<1x128x128xf32> to vector<128x128xf32>
    %cst_35 = arith.constant dense<0.000000e+00> : vector<8x128xf32>
    %37 = tpu.matmul %34, %36, %cst_35 {dimension_numbers = #tpu.dot_dimension_numbers<[1], [0], [0], [1], [0, 0, 1, 1], [], []>} : vector<8x128xf32>, vector<128x128xf32>, vector<8x128xf32> -> vector<8x128xf32>
    %c1 = arith.constant 1 : index
    %c0_36 = arith.constant 0 : index
    %c0_37 = arith.constant 0 : index
    %38 = vector.load %arg7[%c1, %c0_36, %c0_37] : memref<2x1x128xf32, #tpu.memory_space<vmem>>, vector<1x1x128xf32>
    %39 = vector.shape_cast %38 : vector<1x1x128xf32> to vector<1x128xf32>
    %40 = vector.broadcast %39 : vector<1x128xf32> to vector<8x128xf32>
    %41 = arith.addf %37, %40 : vector<8x128xf32>
    %42 = vector.shape_cast %41 : vector<8x128xf32> to vector<1x8x128xf32>
    %c0_38 = arith.constant 0 : index
    %c0_39 = arith.constant 0 : index
    %c0_40 = arith.constant 0 : index
    %43 = vector.load %arg8[%c0_38, %c0_39, %c0_40] : memref<1x8x128xf32, #tpu.memory_space<vmem>>, vector<1x8x128xf32>
    tpu.vector_store %arg8[%c0_38, %c0_39, %c0_40], %42 {strides = array<i32>} : memref<1x8x128xf32, #tpu.memory_space<vmem>>, vector<1x8x128xf32>,
    %c1_41 = arith.constant 1 : index
    %c0_42 = arith.constant 0 : index
    %c0_43 = arith.constant 0 : index
    %44 = vector.load %arg6[%c1_41, %c0_42, %c0_43] : memref<2x128x128xf32, #tpu.memory_space<vmem>>, vector<1x128x128xf32>
    %45 = vector.shape_cast %44 : vector<1x128x128xf32> to vector<128x128xf32>
    %c1_44 = arith.constant 1 : index
    %c0_45 = arith.constant 0 : index
    %c0_46 = arith.constant 0 : index
    %46 = vector.load %arg10[%c1_44, %c0_45, %c0_46] : memref<2x8x128xf32, #tpu.memory_space<vmem>>, vector<1x8x128xf32>
    %47 = vector.shape_cast %46 : vector<1x8x128xf32> to vector<8x128xf32>
    %c0_i32_47 = arith.constant 0 : i32
    %48 = arith.index_cast %c0_i32_47 : i32 to index
    %c0_48 = arith.constant 0 : index
    %c0_49 = arith.constant 0 : index
    %49 = vector.load %arg8[%48, %c0_48, %c0_49] : memref<1x8x128xf32, #tpu.memory_space<vmem>>, vector<1x8x128xf32>
    %50 = vector.shape_cast %49 : vector<1x8x128xf32> to vector<8x128xf32>
    %cst_50 = arith.constant dense<0.000000e+00> : vector<8x128xf32>
    %51 = tpu.matmul %47, %45, %cst_50 {dimension_numbers = #tpu.dot_dimension_numbers<[1], [0], [0], [1], [0, 0, 1, 1], [], []>} : vector<8x128xf32>, vector<128x128xf32>, vector<8x128xf32> -> vector<8x128xf32>
    %52 = arith.addf %50, %51 : vector<8x128xf32>
    %53 = math.tanh %52 : vector<8x128xf32>
    %54 = arith.index_cast %c0_i32_47 : i32 to index
    %c0_51 = arith.constant 0 : index
    %c0_52 = arith.constant 0 : index
    %55 = vector.load %arg8[%54, %c0_51, %c0_52] : memref<1x8x128xf32, #tpu.memory_space<vmem>>, vector<1x8x128xf32>
    %56 = vector.shape_cast %55 : vector<1x8x128xf32> to vector<8x128xf32>
    %57 = vector.shape_cast %53 : vector<8x128xf32> to vector<1x8x128xf32>
    tpu.vector_store %arg8[%54, %c0_51, %c0_52], %57 {strides = array<i32>} : memref<1x8x128xf32, #tpu.memory_space<vmem>>, vector<1x8x128xf32>,
    %c1_i32_53 = arith.constant 1 : i32
    %c1_54 = arith.constant 1 : index
    %c0_55 = arith.constant 0 : index
    %c0_56 = arith.constant 0 : index
    %58 = vector.load %arg10[%c1_54, %c0_55, %c0_56] : memref<2x8x128xf32, #tpu.memory_space<vmem>>, vector<1x8x128xf32>
    %59 = vector.shape_cast %58 : vector<1x8x128xf32> to vector<8x128xf32>
    %60 = vector.shape_cast %53 : vector<8x128xf32> to vector<1x8x128xf32>
    tpu.vector_store %arg10[%c1_54, %c0_55, %c0_56], %60 {strides = array<i32>} : memref<2x8x128xf32, #tpu.memory_space<vmem>>, vector<1x8x128xf32>,
    %c1_57 = arith.constant 1 : index
    %c0_58 = arith.constant 0 : index
    %c0_59 = arith.constant 0 : index
    %61 = vector.load %arg9[%c1_57, %c0_58, %c0_59] : memref<2x8x128xf32, #tpu.memory_space<vmem>>, vector<1x8x128xf32>
    %62 = vector.shape_cast %61 : vector<1x8x128xf32> to vector<8x128xf32>
    %63 = vector.shape_cast %53 : vector<8x128xf32> to vector<1x8x128xf32>
    tpu.vector_store %arg9[%c1_57, %c0_58, %c0_59], %63 {strides = array<i32>} : memref<2x8x128xf32, #tpu.memory_space<vmem>>, vector<1x8x128xf32>,
    return
  }
  func.func @transform_0(%arg0: i32, %arg1: i32) -> (i32, i32, i32) {
    %c0_i32 = arith.constant 0 : i32
    %c0_i32_0 = arith.constant 0 : i32
    return %arg1, %arg0, %c0_i32 : i32, i32, i32
  }
  func.func @transform_1(%arg0: i32, %arg1: i32) -> (i32, i32, i32) {
    %c0_i32 = arith.constant 0 : i32
    %c0_i32_0 = arith.constant 0 : i32
    %c0_i32_1 = arith.constant 0 : i32
    return %c0_i32, %arg0, %c0_i32_0 : i32, i32, i32
  }
  func.func @transform_2(%arg0: i32, %arg1: i32) -> (i32, i32) {
    %c0_i32 = arith.constant 0 : i32
    %c0_i32_0 = arith.constant 0 : i32
    %c0_i32_1 = arith.constant 0 : i32
    return %c0_i32, %c0_i32_0 : i32, i32
  }
  func.func @transform_3(%arg0: i32, %arg1: i32) -> (i32, i32, i32) {
    %c0_i32 = arith.constant 0 : i32
    %c0_i32_0 = arith.constant 0 : i32
    %c0_i32_1 = arith.constant 0 : i32
    %c0_i32_2 = arith.constant 0 : i32
    return %c0_i32, %c0_i32_0, %c0_i32_1 : i32, i32, i32
  }
  func.func @transform_4(%arg0: i32, %arg1: i32) -> (i32, i32, i32) {
    %c0_i32 = arith.constant 0 : i32
    %c0_i32_0 = arith.constant 0 : i32
    %c0_i32_1 = arith.constant 0 : i32
    %c0_i32_2 = arith.constant 0 : i32
    return %c0_i32, %c0_i32_0, %c0_i32_1 : i32, i32, i32
  }
  func.func @transform_5(%arg0: i32, %arg1: i32) -> (i32, i32, i32) {
    %c0_i32 = arith.constant 0 : i32
    %c0_i32_0 = arith.constant 0 : i32
    %c0_i32_1 = arith.constant 0 : i32
    %c0_i32_2 = arith.constant 0 : i32
    return %c0_i32, %c0_i32_0, %c0_i32_1 : i32, i32, i32
  }
  func.func @transform_6(%arg0: i32, %arg1: i32) -> (i32, i32, i32) {
    %c0_i32 = arith.constant 0 : i32
    %c0_i32_0 = arith.constant 0 : i32
    return %arg1, %arg0, %c0_i32 : i32, i32, i32
  }
  func.func @transform_7(%arg0: i32, %arg1: i32) -> (i32, i32, i32) {
    %c0_i32 = arith.constant 0 : i32
    %c0_i32_0 = arith.constant 0 : i32
    %c0_i32_1 = arith.constant 0 : i32
    return %c0_i32, %arg0, %c0_i32_0 : i32, i32, i32
  }
}

module attributes {stable_mosaic.version = 11 : i64} {
  func.func @_rnn_kernel(%arg0: i32, %arg1: i32, %arg2: memref<1x8x128xf32, #tpu.memory_space<vmem>>, %arg3: memref<2x8x128xf32, #tpu.memory_space<vmem>>, %arg4: memref<128x128xf32, #tpu.memory_space<vmem>>, %arg5: memref<1x128x128xf32, #tpu.memory_space<vmem>>, %arg6: memref<2x128x128xf32, #tpu.memory_space<vmem>>, %arg7: memref<2x1x128xf32, #tpu.memory_space<vmem>>, %arg8: memref<1x8x128xf32, #tpu.memory_space<vmem>>, %arg9: memref<2x8x128xf32, #tpu.memory_space<vmem>>, %arg10: memref<2x8x128xf32, #tpu.memory_space<vmem>>, %arg11: memref<1x8x128xf32, #tpu.memory_space<vmem>>) attributes {dimension_semantics = [#tpu.dimension_semantics<parallel>, #tpu.dimension_semantics<arbitrary>], iteration_bounds = array<i64: 1, 1>, scalar_prefetch = 0 : i64, scratch_operands = 2 : i64, tpu.core_type = #tpu.core_type<tc>, window_params = [{transform_indices = @transform_0, window_bounds = array<i64: 1, 8, 128>}, {transform_indices = @transform_1, window_bounds = array<i64: 2, 8, 128>}, {pipeline_mode = #tpu.pipeline_mode<synchronous>, transform_indices = @transform_2, window_bounds = array<i64: 128, 128>}, {pipeline_mode = #tpu.pipeline_mode<synchronous>, transform_indices = @transform_3, window_bounds = array<i64: 1, 128, 128>}, {pipeline_mode = #tpu.pipeline_mode<synchronous>, transform_indices = @transform_4, window_bounds = array<i64: 2, 128, 128>}, {pipeline_mode = #tpu.pipeline_mode<synchronous>, transform_indices = @transform_5, window_bounds = array<i64: 2, 1, 128>}, {transform_indices = @transform_6, window_bounds = array<i64: 1, 8, 128>}, {transform_indices = @transform_7, window_bounds = array<i64: 2, 8, 128>}]} {
    %c0_i32 = arith.constant 0 : i32
    %0 = arith.cmpi eq, %arg1, %c0_i32 : i32
    %1 = arith.extui %0 : i1 to i32
    %c0_i32_0 = arith.constant 0 : i32
    %2 = arith.cmpi ne, %1, %c0_i32_0 : i32
    scf.if %2 {
      %c0_60 = arith.constant 0 : index
      %c0_61 = arith.constant 0 : index
      %c0_62 = arith.constant 0 : index
      %64 = vector.load %arg3[%c0_60, %c0_61, %c0_62] : memref<2x8x128xf32, #tpu.memory_space<vmem>>, vector<2x8x128xf32>
      %c0_63 = arith.constant 0 : index
      %c0_64 = arith.constant 0 : index
      %c0_65 = arith.constant 0 : index
      %65 = vector.load %arg10[%c0_63, %c0_64, %c0_65] : memref<2x8x128xf32, #tpu.memory_space<vmem>>, vector<2x8x128xf32>
      tpu.vector_store %arg10[%c0_63, %c0_64, %c0_65], %64 {strides = array<i32>} : memref<2x8x128xf32, #tpu.memory_space<vmem>>, vector<2x8x128xf32>,
    } else {
    }
    %c0 = arith.constant 0 : index
    %c0_1 = arith.constant 0 : index
    %c0_2 = arith.constant 0 : index
    %3 = vector.load %arg2[%c0, %c0_1, %c0_2] : memref<1x8x128xf32, #tpu.memory_space<vmem>>, vector<1x8x128xf32>
    %4 = vector.shape_cast %3 : vector<1x8x128xf32> to vector<8x128xf32>
    %c0_3 = arith.constant 0 : index
    %c0_4 = arith.constant 0 : index
    %5 = vector.load %arg4[%c0_3, %c0_4] : memref<128x128xf32, #tpu.memory_space<vmem>>, vector<128x128xf32>
    %cst = arith.constant dense<0.000000e+00> : vector<8x128xf32>
    %6 = tpu.matmul %4, %5, %cst {dimension_numbers = #tpu.dot_dimension_numbers<[1], [0], [0], [1], [0, 0, 1, 1], [], []>} : vector<8x128xf32>, vector<128x128xf32>, vector<8x128xf32> -> vector<8x128xf32>
    %c0_5 = arith.constant 0 : index
    %c0_6 = arith.constant 0 : index
    %c0_7 = arith.constant 0 : index
    %7 = vector.load %arg7[%c0_5, %c0_6, %c0_7] : memref<2x1x128xf32, #tpu.memory_space<vmem>>, vector<1x1x128xf32>
    %8 = vector.shape_cast %7 : vector<1x1x128xf32> to vector<1x128xf32>
    %9 = vector.broadcast %8 : vector<1x128xf32> to vector<8x128xf32>
    %10 = arith.addf %6, %9 : vector<8x128xf32>
    %11 = vector.shape_cast %10 : vector<8x128xf32> to vector<1x8x128xf32>
    %c0_8 = arith.constant 0 : index
    %c0_9 = arith.constant 0 : index
    %c0_10 = arith.constant 0 : index
    %12 = vector.load %arg11[%c0_8, %c0_9, %c0_10] : memref<1x8x128xf32, #tpu.memory_space<vmem>>, vector<1x8x128xf32>
    tpu.vector_store %arg11[%c0_8, %c0_9, %c0_10], %11 {strides = array<i32>} : memref<1x8x128xf32, #tpu.memory_space<vmem>>, vector<1x8x128xf32>,
    %c0_11 = arith.constant 0 : index
    %c0_12 = arith.constant 0 : index
    %c0_13 = arith.constant 0 : index
    %13 = vector.load %arg6[%c0_11, %c0_12, %c0_13] : memref<2x128x128xf32, #tpu.memory_space<vmem>>, vector<1x128x128xf32>
    %14 = vector.shape_cast %13 : vector<1x128x128xf32> to vector<128x128xf32>
    %c0_14 = arith.constant 0 : index
    %c0_15 = arith.constant 0 : index
    %c0_16 = arith.constant 0 : index
    %15 = vector.load %arg10[%c0_14, %c0_15, %c0_16] : memref<2x8x128xf32, #tpu.memory_space<vmem>>, vector<1x8x128xf32>
    %16 = vector.shape_cast %15 : vector<1x8x128xf32> to vector<8x128xf32>
    %c0_i32_17 = arith.constant 0 : i32
    %17 = arith.index_cast %c0_i32_17 : i32 to index
    %c0_18 = arith.constant 0 : index
    %c0_19 = arith.constant 0 : index
    %18 = vector.load %arg11[%17, %c0_18, %c0_19] : memref<1x8x128xf32, #tpu.memory_space<vmem>>, vector<1x8x128xf32>
    %19 = vector.shape_cast %18 : vector<1x8x128xf32> to vector<8x128xf32>
    %cst_20 = arith.constant dense<0.000000e+00> : vector<8x128xf32>
    %20 = tpu.matmul %16, %14, %cst_20 {dimension_numbers = #tpu.dot_dimension_numbers<[1], [0], [0], [1], [0, 0, 1, 1], [], []>} : vector<8x128xf32>, vector<128x128xf32>, vector<8x128xf32> -> vector<8x128xf32>
    %21 = arith.addf %19, %20 : vector<8x128xf32>
    %22 = math.tanh %21 : vector<8x128xf32>
    %23 = arith.index_cast %c0_i32_17 : i32 to index
    %c0_21 = arith.constant 0 : index
    %c0_22 = arith.constant 0 : index
    %24 = vector.load %arg11[%23, %c0_21, %c0_22] : memref<1x8x128xf32, #tpu.memory_space<vmem>>, vector<1x8x128xf32>
    %25 = vector.shape_cast %24 : vector<1x8x128xf32> to vector<8x128xf32>
    %26 = vector.shape_cast %22 : vector<8x128xf32> to vector<1x8x128xf32>
    tpu.vector_store %arg11[%23, %c0_21, %c0_22], %26 {strides = array<i32>} : memref<1x8x128xf32, #tpu.memory_space<vmem>>, vector<1x8x128xf32>,
    %c1_i32 = arith.constant 1 : i32
    %c0_23 = arith.constant 0 : index
    %c0_24 = arith.constant 0 : index
    %c0_25 = arith.constant 0 : index
    %27 = vector.load %arg10[%c0_23, %c0_24, %c0_25] : memref<2x8x128xf32, #tpu.memory_space<vmem>>, vector<1x8x128xf32>
    %28 = vector.shape_cast %27 : vector<1x8x128xf32> to vector<8x128xf32>
    %29 = vector.shape_cast %22 : vector<8x128xf32> to vector<1x8x128xf32>
    tpu.vector_store %arg10[%c0_23, %c0_24, %c0_25], %29 {strides = array<i32>} : memref<2x8x128xf32, #tpu.memory_space<vmem>>, vector<1x8x128xf32>,
    %c0_26 = arith.constant 0 : index
    %c0_27 = arith.constant 0 : index
    %c0_28 = arith.constant 0 : index
    %30 = vector.load %arg9[%c0_26, %c0_27, %c0_28] : memref<2x8x128xf32, #tpu.memory_space<vmem>>, vector<1x8x128xf32>
    %31 = vector.shape_cast %30 : vector<1x8x128xf32> to vector<8x128xf32>
    %32 = vector.shape_cast %22 : vector<8x128xf32> to vector<1x8x128xf32>
    tpu.vector_store %arg9[%c0_26, %c0_27, %c0_28], %32 {strides = array<i32>} : memref<2x8x128xf32, #tpu.memory_space<vmem>>, vector<1x8x128xf32>,
    %c0_29 = arith.constant 0 : index
    %c0_30 = arith.constant 0 : index
    %c0_31 = arith.constant 0 : index
    %33 = vector.load %arg11[%c0_29, %c0_30, %c0_31] : memref<1x8x128xf32, #tpu.memory_space<vmem>>, vector<1x8x128xf32>
    %34 = vector.shape_cast %33 : vector<1x8x128xf32> to vector<8x128xf32>
    %c0_32 = arith.constant 0 : index
    %c0_33 = arith.constant 0 : index
    %c0_34 = arith.constant 0 : index
    %35 = vector.load %arg5[%c0_32, %c0_33, %c0_34] : memref<1x128x128xf32, #tpu.memory_space<vmem>>, vector<1x128x128xf32>
    %36 = vector.shape_cast %35 : vector<1x128x128xf32> to vector<128x128xf32>
    %cst_35 = arith.constant dense<0.000000e+00> : vector<8x128xf32>
    %37 = tpu.matmul %34, %36, %cst_35 {dimension_numbers = #tpu.dot_dimension_numbers<[1], [0], [0], [1], [0, 0, 1, 1], [], []>} : vector<8x128xf32>, vector<128x128xf32>, vector<8x128xf32> -> vector<8x128xf32>
    %c1 = arith.constant 1 : index
    %c0_36 = arith.constant 0 : index
    %c0_37 = arith.constant 0 : index
    %38 = vector.load %arg7[%c1, %c0_36, %c0_37] : memref<2x1x128xf32, #tpu.memory_space<vmem>>, vector<1x1x128xf32>
    %39 = vector.shape_cast %38 : vector<1x1x128xf32> to vector<1x128xf32>
    %40 = vector.broadcast %39 : vector<1x128xf32> to vector<8x128xf32>
    %41 = arith.addf %37, %40 : vector<8x128xf32>
    %42 = vector.shape_cast %41 : vector<8x128xf32> to vector<1x8x128xf32>
    %c0_38 = arith.constant 0 : index
    %c0_39 = arith.constant 0 : index
    %c0_40 = arith.constant 0 : index
    %43 = vector.load %arg8[%c0_38, %c0_39, %c0_40] : memref<1x8x128xf32, #tpu.memory_space<vmem>>, vector<1x8x128xf32>
    tpu.vector_store %arg8[%c0_38, %c0_39, %c0_40], %42 {strides = array<i32>} : memref<1x8x128xf32, #tpu.memory_space<vmem>>, vector<1x8x128xf32>,
    %c1_41 = arith.constant 1 : index
    %c0_42 = arith.constant 0 : index
    %c0_43 = arith.constant 0 : index
    %44 = vector.load %arg6[%c1_41, %c0_42, %c0_43] : memref<2x128x128xf32, #tpu.memory_space<vmem>>, vector<1x128x128xf32>
    %45 = vector.shape_cast %44 : vector<1x128x128xf32> to vector<128x128xf32>
    %c1_44 = arith.constant 1 : index
    %c0_45 = arith.constant 0 : index
    %c0_46 = arith.constant 0 : index
    %46 = vector.load %arg10[%c1_44, %c0_45, %c0_46] : memref<2x8x128xf32, #tpu.memory_space<vmem>>, vector<1x8x128xf32>
    %47 = vector.shape_cast %46 : vector<1x8x128xf32> to vector<8x128xf32>
    %c0_i32_47 = arith.constant 0 : i32
    %48 = arith.index_cast %c0_i32_47 : i32 to index
    %c0_48 = arith.constant 0 : index
    %c0_49 = arith.constant 0 : index
    %49 = vector.load %arg8[%48, %c0_48, %c0_49] : memref<1x8x128xf32, #tpu.memory_space<vmem>>, vector<1x8x128xf32>
    %50 = vector.shape_cast %49 : vector<1x8x128xf32> to vector<8x128xf32>
    %cst_50 = arith.constant dense<0.000000e+00> : vector<8x128xf32>
    %51 = tpu.matmul %47, %45, %cst_50 {dimension_numbers = #tpu.dot_dimension_numbers<[1], [0], [0], [1], [0, 0, 1, 1], [], []>} : vector<8x128xf32>, vector<128x128xf32>, vector<8x128xf32> -> vector<8x128xf32>
    %52 = arith.addf %50, %51 : vector<8x128xf32>
    %53 = math.tanh %52 : vector<8x128xf32>
    %54 = arith.index_cast %c0_i32_47 : i32 to index
    %c0_51 = arith.constant 0 : index
    %c0_52 = arith.constant 0 : index
    %55 = vector.load %arg8[%54, %c0_51, %c0_52] : memref<1x8x128xf32, #tpu.memory_space<vmem>>, vector<1x8x128xf32>
    %56 = vector.shape_cast %55 : vector<1x8x128xf32> to vector<8x128xf32>
    %57 = vector.shape_cast %53 : vector<8x128xf32> to vector<1x8x128xf32>
    tpu.vector_store %arg8[%54, %c0_51, %c0_52], %57 {strides = array<i32>} : memref<1x8x128xf32, #tpu.memory_space<vmem>>, vector<1x8x128xf32>,
    %c1_i32_53 = arith.constant 1 : i32
    %c1_54 = arith.constant 1 : index
    %c0_55 = arith.constant 0 : index
    %c0_56 = arith.constant 0 : index
    %58 = vector.load %arg10[%c1_54, %c0_55, %c0_56] : memref<2x8x128xf32, #tpu.memory_space<vmem>>, vector<1x8x128xf32>
    %59 = vector.shape_cast %58 : vector<1x8x128xf32> to vector<8x128xf32>
    %60 = vector.shape_cast %53 : vector<8x128xf32> to vector<1x8x128xf32>
    tpu.vector_store %arg10[%c1_54, %c0_55, %c0_56], %60 {strides = array<i32>} : memref<2x8x128xf32, #tpu.memory_space<vmem>>, vector<1x8x128xf32>,
    %c1_57 = arith.constant 1 : index
    %c0_58 = arith.constant 0 : index
    %c0_59 = arith.constant 0 : index
    %61 = vector.load %arg9[%c1_57, %c0_58, %c0_59] : memref<2x8x128xf32, #tpu.memory_space<vmem>>, vector<1x8x128xf32>
    %62 = vector.shape_cast %61 : vector<1x8x128xf32> to vector<8x128xf32>
    %63 = vector.shape_cast %53 : vector<8x128xf32> to vector<1x8x128xf32>
    tpu.vector_store %arg9[%c1_57, %c0_58, %c0_59], %63 {strides = array<i32>} : memref<2x8x128xf32, #tpu.memory_space<vmem>>, vector<1x8x128xf32>,
    return
  }
  func.func @transform_0(%arg0: i32, %arg1: i32) -> (i32, i32, i32) {
    %c0_i32 = arith.constant 0 : i32
    %c0_i32_0 = arith.constant 0 : i32
    return %arg1, %arg0, %c0_i32 : i32, i32, i32
  }
  func.func @transform_1(%arg0: i32, %arg1: i32) -> (i32, i32, i32) {
    %c0_i32 = arith.constant 0 : i32
    %c0_i32_0 = arith.constant 0 : i32
    %c0_i32_1 = arith.constant 0 : i32
    return %c0_i32, %arg0, %c0_i32_0 : i32, i32, i32
  }
  func.func @transform_2(%arg0: i32, %arg1: i32) -> (i32, i32) {
    %c0_i32 = arith.constant 0 : i32
    %c0_i32_0 = arith.constant 0 : i32
    %c0_i32_1 = arith.constant 0 : i32
    return %c0_i32, %c0_i32_0 : i32, i32
  }
  func.func @transform_3(%arg0: i32, %arg1: i32) -> (i32, i32, i32) {
    %c0_i32 = arith.constant 0 : i32
    %c0_i32_0 = arith.constant 0 : i32
    %c0_i32_1 = arith.constant 0 : i32
    %c0_i32_2 = arith.constant 0 : i32
    return %c0_i32, %c0_i32_0, %c0_i32_1 : i32, i32, i32
  }
  func.func @transform_4(%arg0: i32, %arg1: i32) -> (i32, i32, i32) {
    %c0_i32 = arith.constant 0 : i32
    %c0_i32_0 = arith.constant 0 : i32
    %c0_i32_1 = arith.constant 0 : i32
    %c0_i32_2 = arith.constant 0 : i32
    return %c0_i32, %c0_i32_0, %c0_i32_1 : i32, i32, i32
  }
  func.func @transform_5(%arg0: i32, %arg1: i32) -> (i32, i32, i32) {
    %c0_i32 = arith.constant 0 : i32
    %c0_i32_0 = arith.constant 0 : i32
    %c0_i32_1 = arith.constant 0 : i32
    %c0_i32_2 = arith.constant 0 : i32
    return %c0_i32, %c0_i32_0, %c0_i32_1 : i32, i32, i32
  }
  func.func @transform_6(%arg0: i32, %arg1: i32) -> (i32, i32, i32) {
    %c0_i32 = arith.constant 0 : i32
    %c0_i32_0 = arith.constant 0 : i32
    return %arg1, %arg0, %c0_i32 : i32, i32, i32
  }
  func.func @transform_7(%arg0: i32, %arg1: i32) -> (i32, i32, i32) {
    %c0_i32 = arith.constant 0 : i32
    %c0_i32_0 = arith.constant 0 : i32
    %c0_i32_1 = arith.constant 0 : i32
    return %c0_i32, %arg0, %c0_i32_0 : i32, i32, i32
  }
}

</mosaic_0001>

<bundles_post_ra>
// kernel: tpu_custom_call.1
= control target key start
LH: loop header
LB: loop body
LE: loop exit
PB: predicated region body
PF: predicated region fallthrough
CT: control target
= control target key end

     0   :  { %13 = vsyncpa [#allocation5], 0  ;;  %s1213_s0 = inlined_call_operand.hbm [shape: f32[1,8,128], index: 0, kind: input, shape index: {}]   ;;  %s1214_s1 = inlined_call_operand.hbm [shape: f32[2,8,128], index: 1, kind: input, shape index: {}]   ;;  %s1215_s2 = inlined_call_operand.hbm [shape: f32[128,128], index: 2, kind: input, shape index: {}]   ;;  %s1216_s3 = inlined_call_operand.hbm [shape: f32[1,128,128], index: 3, kind: input, shape index: {}]   ;;  %s1217_s4 = inlined_call_operand.hbm [shape: f32[2,128,128], index: 4, kind: input, shape index: {}]   ;;  %s1218_s5 = inlined_call_operand.vmem [shape: f32[2,1,128], index: 5, kind: input, shape index: {}]   ;;  %s1219_s6 = inlined_call_operand.hbm [shape: f32[1,8,128], index: 6, kind: output, shape index: {0}]   ;;  %s1220_s7 = inlined_call_operand.hbm [shape: f32[2,8,128], index: 7, kind: output, shape index: {1}]  }
   0x1   :  { %14 = vsyncpa [#allocation8], 0 }
   0x2   :  { %15 = vsyncpa [#allocation11], 0 }
   0x3   :  { %16 = vsyncpa [#allocation6], 0 }
   0x4   :  { %17 = vsyncpa [#allocation15], 0  ;;  %s1009_s24 = smov [#allocation7]   ;;  %s845_s28 = scalar_lea.hbm %s1214_s1, 256 }
   0x5   :  { %s33_s25 = sshll.u32 %s1009_s24, 4  ;;  %p846_p0 = scmp.ne.s32.totalorder %s1214_s1, %s845_s28  ;;  %s34_s25 = int_to_ptr.vmem [resolvable:$true] %s33_s25 }
   0x6   :  { %p849_p1 = scmp.lt.u32.totalorder %s845_s28, %s1214_s1 }
   0x8   :  { %p851_p2 = pnand %p849_p1, %p846_p0 }
   0xa   :  { %854 = shalt.err (!%p851_p2)
}
   0xb   :  { %s855_s10 = scalar_lea.vmem %s34_s25, 256  ;;  %p860_p4 = scmp.lt.s32.totalorder %s34_s25, %s34_s25 }
   0xc   :  { %p856_p3 = scmp.ne.s32.totalorder %s34_s25, %s855_s10  ;;  %p861_p5 = scmp.lt.s32.totalorder %s855_s10, %s855_s10 }
   0xe   :  { %p862_p6 = por %p861_p5, %p860_p4 }
  0x10   :  { %p863_p7 = pnand %p862_p6, %p856_p3 }
  0x12   :  { %866 = shalt.err (!%p863_p7)
}
  0x13   :  { %s1010_s11 = smov 128   ;;  %s1011_s12 = smov 8  }
  0x14   :  { %39 = dma.hbm_to_vmem [thread:$0]  %s1214_s1, 256, %s34_s25, [#allocation8], %s1010_s11, %s1010_s11, %s1011_s12  }
  0x15   :  { %s1012_s15 = smov [#allocation10]   ;;  %s1013_s17 = smov [#allocation4]  }
  0x16   :  { %s57_s16 = sshll.u32 %s1012_s15, 4  ;;  %s24_s18 = sshll.u32 %s1013_s17, 4  ;;  %s58_s16 = int_to_ptr.vmem [resolvable:$true] %s57_s16  ;;  %s25_s18 = int_to_ptr.vmem [resolvable:$true] %s24_s18 }
  0x17   :  { %s867_s21 = scalar_lea.hbm %s1216_s3, 2048 }
  0x18   :  { %p868_p8 = scmp.ne.s32.totalorder %s1216_s3, %s867_s21  ;;  %p871_p9 = scmp.lt.u32.totalorder %s867_s21, %s1216_s3 }
  0x1a   :  { %p873_p10 = pnand %p871_p9, %p868_p8 }
  0x1c   :  { %876 = shalt.err (!%p873_p10)
}
  0x1d   :  { %s877_s1 = scalar_lea.vmem %s58_s16, 2048  ;;  %p882_p12 = scmp.lt.s32.totalorder %s58_s16, %s58_s16 }
  0x1e   :  { %p878_p11 = scmp.ne.s32.totalorder %s58_s16, %s877_s1  ;;  %p883_p13 = scmp.lt.s32.totalorder %s877_s1, %s877_s1 }
  0x20   :  { %p884_p0 = por %p883_p13, %p882_p12 }
  0x22   :  { %p885_p1 = pnand %p884_p0, %p878_p11 }
  0x24   :  { %888 = shalt.err (!%p885_p1)
}
  0x25   :  { %63 = dma.hbm_to_vmem [thread:$0]  %s1216_s3, 2048, %s58_s16, [#allocation11], %s1010_s11, %s1010_s11, %s1011_s12  }
  0x26   :  { %s889_s30 = scalar_lea.hbm %s1213_s0, 128 }
  0x27   :  { %p890_p2 = scmp.ne.s32.totalorder %s1213_s0, %s889_s30  ;;  %p893_p3 = scmp.lt.u32.totalorder %s889_s30, %s1213_s0 }
  0x29   :  { %p895_p4 = pnand %p893_p3, %p890_p2 }
  0x2b   :  { %898 = shalt.err (!%p895_p4)
}
  0x2c   :  { %s899_s14 = scalar_lea.vmem %s25_s18, 128  ;;  %p904_p6 = scmp.lt.s32.totalorder %s25_s18, %s25_s18 }
  0x2d   :  { %p900_p5 = scmp.ne.s32.totalorder %s25_s18, %s899_s14  ;;  %p905_p7 = scmp.lt.s32.totalorder %s899_s14, %s899_s14 }
  0x2f   :  { %p906_p8 = por %p905_p7, %p904_p6 }
  0x31   :  { %p907_p9 = pnand %p906_p8, %p900_p5 }
  0x33   :  { %910 = shalt.err (!%p907_p9)
}
  0x34   :  { %27 = dma.hbm_to_vmem [thread:$0]  %s1213_s0, 128, %s25_s18, [#allocation5]  }
  0x35   :  { %s1014_s16 = smov [#allocation9]   ;;  %s1015_s19 = smov [#allocation12]  }
  0x36   :  { %s45_s17 = sshll.u32 %s1014_s16, 4  ;;  %s69_s20 = sshll.u32 %s1015_s19, 4  ;;  %s46_s17 = int_to_ptr.vmem [resolvable:$true] %s45_s17  ;;  %s70_s20 = int_to_ptr.vmem [resolvable:$true] %s69_s20 }
  0x37   :  { %s911_s23 = scalar_lea.hbm %s1215_s2, 2048 }
  0x38   :  { %p912_p10 = scmp.ne.s32.totalorder %s1215_s2, %s911_s23  ;;  %p915_p11 = scmp.lt.u32.totalorder %s911_s23, %s1215_s2 }
  0x3a   :  { %p917_p12 = pnand %p915_p11, %p912_p10 }
  0x3c   :  { %920 = shalt.err (!%p917_p12)
}
  0x3d   :  { %s921_s0 = scalar_lea.vmem %s46_s17, 2048  ;;  %p926_p0 = scmp.lt.s32.totalorder %s46_s17, %s46_s17 }
  0x3e   :  { %p922_p13 = scmp.ne.s32.totalorder %s46_s17, %s921_s0  ;;  %p927_p1 = scmp.lt.s32.totalorder %s921_s0, %s921_s0 }
  0x40   :  { %p928_p2 = por %p927_p1, %p926_p0 }
  0x42   :  { %p929_p3 = pnand %p928_p2, %p922_p13 }
  0x44   :  { %932 = shalt.err (!%p929_p3)
}
  0x45   :  { %51 = dma.hbm_to_vmem [thread:$0]  %s1215_s2, 2048, %s46_s17, [#allocation8], %s1010_s11, %s1010_s11, %s1011_s12  }
  0x46   :  { %s933_s30 = scalar_lea.hbm %s1217_s4, 4096 }
  0x47   :  { %p934_p4 = scmp.ne.s32.totalorder %s1217_s4, %s933_s30  ;;  %p937_p5 = scmp.lt.u32.totalorder %s933_s30, %s1217_s4 }
  0x49   :  { %p939_p6 = pnand %p937_p5, %p934_p4 }
  0x4b   :  { %942 = shalt.err (!%p939_p6)
}
  0x4c   :  { %s943_s14 = scalar_lea.vmem %s70_s20, 4096  ;;  %p948_p8 = scmp.lt.s32.totalorder %s70_s20, %s70_s20 }
  0x4d   :  { %p944_p7 = scmp.ne.s32.totalorder %s70_s20, %s943_s14  ;;  %p949_p9 = scmp.lt.s32.totalorder %s943_s14, %s943_s14 }
  0x4f   :  { %p950_p10 = por %p949_p9, %p948_p8 }
  0x51   :  { %p951_p11 = pnand %p950_p10, %p944_p7 }
  0x53   :  { %954 = shalt.err (!%p951_p11)
}
  0x54   :  { %75 = dma.hbm_to_vmem [thread:$0]  %s1217_s4, 4096, %s70_s20, [#allocation11], %s1010_s11, %s1010_s11, %s1011_s12  }
  0x55   :  { %999 = dma.done.wait [#allocation5], 128  }
  0x56   :  { %1000 = vsyncadd [#allocation5], 4294967168 }
  0x57   :  { %1001 = dma.done.wait [#allocation8], 2304  }
  0x58   :  { %1002 = vsyncadd [#allocation8], 4294964992 }
  0x59   :  { %1003 = dma.done.wait [#allocation11], 6144  }
  0x5a   :  { %1004 = vsyncadd [#allocation11], 4294961152  ;;  %v1016_v0 = vmov 0.0|0.0   ;;  %vm1017_vm0 = vmmov 0   ;;  %v1018_v1 = vmov 0.0   ;;  %v102_v2 = vld [vmem:[#allocation9] sm:$0xff] }
  0x5b   :  { %725 = vmatprep.subr.bf16.mxu0 %v1016_v0  ;;  %617 = vmatprep.mubr.msk.f32.mxu0 %vm1017_vm0, %v1018_v1  ;;  %v103_v3 = vld [vmem:[#allocation9 + $0x8] sm:$0xff]  ;;  %v104_v4 = vld [vmem:[#allocation9 + $0x10] sm:$0xff]  ;;  %v105_v6 = vld [vmem:[#allocation9 + $0x18] sm:$0xff]  ;;  %s1019_s19 = smov [#allocation13]   ;;  %s1020_s21 = smov [#allocation14]  }
  0x5c   :  { %773 = vmatprep.subr.bf16.mxu1 %v1016_v0  ;;  %687 = vmatprep.mubr.msk.f32.mxu1 %vm1017_vm0, %v1018_v1  ;;  %v726_v5 = vpack.c.bf16 %v103_v3, %v102_v2  ;;  %v729_v7 = vpack.c.bf16 %v105_v6, %v104_v4  ;;  %v106_v8 = vld [vmem:[#allocation9 + $0x20] sm:$0xff]  ;;  %v107_v9 = vld [vmem:[#allocation9 + $0x28] sm:$0xff]  ;;  %v108_v11 = vld [vmem:[#allocation9 + $0x30] sm:$0xff]  ;;  %s487_s20 = sshll.u32 %s1019_s19, 4  ;;  %s496_s22 = sshll.u32 %s1020_s21, 4  ;;  %s488_s20 = int_to_ptr.vmem [resolvable:$true] %s487_s20  ;;  %s1179_s22 = int_to_ptr.vmem [resolvable:$true] %s496_s22 }
  0x5d   :  { %v732_v10 = vpack.c.bf16 %v107_v9, %v106_v8  ;;  %v109_v12 = vld [vmem:[#allocation9 + $0x38] sm:$0xff]  ;;  %v110_v14 = vld [vmem:[#allocation9 + $0x40] sm:$0xff]  ;;  %v291_v16 = vld [vmem:[#allocation10 + $0x8] sm:$0xff]  ;;  %s955_s23 = scalar_lea.vmem %s488_s20, 128  ;;  %p960_p13 = scmp.lt.s32.totalorder %s488_s20, %s488_s20 }
  0x5e   :  { %727 = vmatpush3.bf16.msra.mxu0 %v726_v5  ;;  %v735_v13 = vpack.c.bf16 %v109_v12, %v108_v11  ;;  %v290_v15 = vld [vmem:[#allocation10] sm:$0xff]  ;;  %v111_v17 = vld [vmem:[#allocation9 + $0x48] sm:$0xff]  ;;  %v292_v19 = vld [vmem:[#allocation10 + $0x10] sm:$0xff]  ;;  %p956_p12 = scmp.ne.s32.totalorder %s488_s20, %s955_s23  ;;  %p961_p0 = scmp.lt.s32.totalorder %s955_s23, %s955_s23 }
  0x5f   :  { %728 = vmatprep.subr.bf16.mxu0 %v1016_v0  ;;  %v774_v18 = vpack.c.bf16 %v291_v16, %v290_v15  ;;  %v293_v20 = vld [vmem:[#allocation10 + $0x18] sm:$0xff]  ;;  %v738_v22 = vpack.c.bf16 %v111_v17, %v110_v14  ;;  %v294_v23 = vld [vmem:[#allocation10 + $0x20] sm:$0xff]  ;;  %v295_v24 = vld [vmem:[#allocation10 + $0x28] sm:$0xff] }
  0x60   :  { %v777_v21 = vpack.c.bf16 %v293_v20, %v292_v19  ;;  %v112_v25 = vld [vmem:[#allocation9 + $0x50] sm:$0xff]  ;;  %v113_v26 = vld [vmem:[#allocation9 + $0x58] sm:$0xff]  ;;  %v780_v27 = vpack.c.bf16 %v295_v24, %v294_v23  ;;  %v114_v31 = vld [vmem:[#allocation9 + $0x60] sm:$0xff]  ;;  %p962_p1 = por %p961_p0, %p960_p13 }
  0x61   :  { %775 = vmatpush3.bf16.msra.mxu1 %v774_v18  ;;  %v741_v28 = vpack.c.bf16 %v113_v26, %v112_v25  ;;  %v296_v29 = vld [vmem:[#allocation10 + $0x30] sm:$0xff]  ;;  %v297_v30 = vld [vmem:[#allocation10 + $0x38] sm:$0xff]  ;;  %v115_v32 = vld [vmem:[#allocation9 + $0x68] sm:$0xff] }
  0x62   :  { %730 = vmatpush3.bf16.msra.mxu0 %v729_v7  ;;  %776 = vmatprep.subr.bf16.mxu1 %v1016_v0  ;;  %v783_v33 = vpack.c.bf16 %v297_v30, %v296_v29  ;;  %v744_v34 = vpack.c.bf16 %v115_v32, %v114_v31  ;;  %v298_v35 = vld [vmem:[#allocation10 + $0x40] sm:$0xff]  ;;  %v299_v36 = vld [vmem:[#allocation10 + $0x48] sm:$0xff]  ;;  %v116_v37 = vld [vmem:[#allocation9 + $0x70] sm:$0xff]  ;;  %p963_p2 = pnand %p962_p1, %p956_p12 }
  0x63   :  { %731 = vmatprep.subr.bf16.mxu0 %v1016_v0  ;;  %v117_v38 = vld [vmem:[#allocation9 + $0x78] sm:$0xff]  ;;  %v786_v39 = vpack.c.bf16 %v299_v36, %v298_v35  ;;  %v196_v41 = vld [vmem:[#allocation12] sm:$0xff]  ;;  %v197_v42 = vld [vmem:[#allocation12 + $0x8] sm:$0xff] }
  0x64   :  { %v747_v40 = vpack.c.bf16 %v117_v38, %v116_v37  ;;  %v101_v43 = vld [vmem:[#allocation4] sm:$0xff]  ;;  %v750_v44 = vpack.c.bf16 %v197_v42, %v196_v41  ;;  %v198_v45 = vld [vmem:[#allocation12 + $0x10] sm:$0xff]  ;;  %v199_v46 = vld [vmem:[#allocation12 + $0x18] sm:$0xff] }
  0x65   :  { %778 = vmatpush3.bf16.msra.mxu1 %v777_v21  ;;  %v753_v47 = vpack.c.bf16 %v199_v46, %v198_v45  ;;  %v200_v48 = vld [vmem:[#allocation12 + $0x20] sm:$0xff]  ;;  %v201_v49 = vld [vmem:[#allocation12 + $0x28] sm:$0xff]  ;;  %v202_v51 = vld [vmem:[#allocation12 + $0x30] sm:$0xff] }
  0x66   :  { %733 = vmatpush3.bf16.msra.mxu0 %v732_v10  ;;  %779 = vmatprep.subr.bf16.mxu1 %v1016_v0  ;;  %v756_v50 = vpack.c.bf16 %v201_v49, %v200_v48  ;;  %v203_v52 = vld [vmem:[#allocation12 + $0x38] sm:$0xff]  ;;  %v204_v54 = vld [vmem:[#allocation12 + $0x40] sm:$0xff]  ;;  %v205_v55 = vld [vmem:[#allocation12 + $0x48] sm:$0xff] }
  0x67   :  { %734 = vmatprep.subr.bf16.mxu0 %v1016_v0  ;;  %v759_v53 = vpack.c.bf16 %v203_v52, %v202_v51  ;;  %v762_v56 = vpack.c.bf16 %v205_v55, %v204_v54  ;;  %v206_v57 = vld [vmem:[#allocation12 + $0x50] sm:$0xff]  ;;  %v207_v58 = vld [vmem:[#allocation12 + $0x58] sm:$0xff]  ;;  %v208_v60 = vld [vmem:[#allocation12 + $0x60] sm:$0xff] }
  0x68   :  { %v765_v59 = vpack.c.bf16 %v207_v58, %v206_v57  ;;  %v209_v61 = vld [vmem:[#allocation12 + $0x68] sm:$0xff]  ;;  %v210_v63 = vld [vmem:[#allocation12 + $0x70] sm:$0xff]  ;;  %v211_v2 = vld [vmem:[#allocation12 + $0x78] sm:$0xff] }
  0x69   :  { %781 = vmatpush3.bf16.msra.mxu1 %v780_v27  ;;  %v768_v62 = vpack.c.bf16 %v209_v61, %v208_v60  ;;  %v771_v3 = vpack.c.bf16 %v211_v2, %v210_v63  ;;  %v97_v4 = vld [vmem:[#allocation7] sm:$0xff]  ;;  %v301_v6 = vld [vmem:[#allocation10 + $0x58] sm:$0xff]  ;;  %v302_v8 = vld [vmem:[#allocation10 + $0x60] sm:$0xff] }
  0x6a   :  { %736 = vmatpush3.bf16.msra.mxu0 %v735_v13  ;;  %782 = vmatprep.subr.bf16.mxu1 %v1016_v0  ;;  %v300_v5 = vld [vmem:[#allocation10 + $0x50] sm:$0xff]  ;;  %v303_v9 = vld [vmem:[#allocation10 + $0x68] sm:$0xff]  ;;  %v305_v12 = vld [vmem:[#allocation10 + $0x78] sm:$0xff] }
  0x6b   :  { %737 = vmatprep.subr.bf16.mxu0 %v1016_v0  ;;  %v789_v7 = vpack.c.bf16 %v301_v6, %v300_v5  ;;  %v792_v10 = vpack.c.bf16 %v303_v9, %v302_v8  ;;  %v304_v11 = vld [vmem:[#allocation10 + $0x70] sm:$0xff]  ;;  %v514_v14 = vld [vmem:[%s1218_s5] ss:$0 sm:$0xff]  ;;  %v386_v18 = vld [vmem:[#allocation12 + $0x80] sm:$0xff] }
  0x6c   :  { %v795_v13 = vpack.c.bf16 %v305_v12, %v304_v11  ;;  %v387_v19 = vld [vmem:[#allocation12 + $0x88] sm:$0xff]  ;;  %v388_v21 = vld [vmem:[#allocation12 + $0x90] sm:$0xff]  ;;  %v390_v25 = vld [vmem:[#allocation12 + $0xa0] sm:$0xff] }
  0x6d   :  { %784 = vmatpush3.bf16.msra.mxu1 %v783_v33  ;;  %v798_v20 = vpack.c.bf16 %v387_v19, %v386_v18  ;;  %v391_v26 = vld [vmem:[#allocation12 + $0xa8] sm:$0xff]  ;;  %v393_v29 = vld [vmem:[#allocation12 + $0xb8] sm:$0xff]  ;;  %v394_v31 = vld [vmem:[#allocation12 + $0xc0] sm:$0xff] }
  0x6e   :  { %739 = vmatpush3.bf16.msra.mxu0 %v738_v22  ;;  %785 = vmatprep.subr.bf16.mxu1 %v1016_v0  ;;  %v389_v22 = vld [vmem:[#allocation12 + $0x98] sm:$0xff]  ;;  %v804_v27 = vpack.c.bf16 %v391_v26, %v390_v25  ;;  %v395_v32 = vld [vmem:[#allocation12 + $0xc8] sm:$0xff]  ;;  %v398_v36 = vld [vmem:[#allocation12 + $0xe0] sm:$0xff] }
  0x6f   :  { %740 = vmatprep.subr.bf16.mxu0 %v1016_v0  ;;  %v801_v24 = vpack.c.bf16 %v389_v22, %v388_v21  ;;  %v810_v33 = vpack.c.bf16 %v395_v32, %v394_v31  ;;  %v399_v37 = vld [vmem:[#allocation12 + $0xe8] sm:$0xff]  ;;  %v98_v42 = vld [vmem:[#allocation7 + $0x8] sm:$0xff] }
  0x70   :  { %v816_v38 = vpack.c.bf16 %v399_v37, %v398_v36 }
  0x71   :  { %787 = vmatpush3.bf16.msra.mxu1 %v786_v39  ;;  %v400_v39 = vld [vmem:[#allocation12 + $0xf0] sm:$0xff] }
  0x72   :  { %742 = vmatpush3.bf16.msra.mxu0 %v741_v28  ;;  %788 = vmatprep.subr.bf16.mxu1 %v1016_v0  ;;  %v392_v28 = vld [vmem:[#allocation12 + $0xb0] sm:$0xff] }
  0x73   :  { %743 = vmatprep.subr.bf16.mxu0 %v1016_v0  ;;  %v807_v30 = vpack.c.bf16 %v393_v29, %v392_v28 }
  0x75   :  { %790 = vmatpush3.bf16.msra.mxu1 %v789_v7 }
  0x76   :  { %745 = vmatpush3.bf16.msra.mxu0 %v744_v34  ;;  %791 = vmatprep.subr.bf16.mxu1 %v1016_v0  ;;  %v397_v34 = vld [vmem:[#allocation12 + $0xd8] sm:$0xff] }
  0x77   :  { %746 = vmatprep.subr.bf16.mxu0 %v1016_v0 }
  0x79   :  { %793 = vmatpush3.bf16.msra.mxu1 %v792_v10 }
  0x7a   :  { %748 = vmatpush3.bf16.msra.mxu0 %v747_v40  ;;  %794 = vmatprep.subr.bf16.mxu1 %v1016_v0  ;;  %v401_v40 = vld [vmem:[#allocation12 + $0xf8] sm:$0xff] }
  0x7b   :  { %749 = vmatprep.subr.bf16.mxu0 %v1016_v0  ;;  %v819_v41 = vpack.c.bf16 %v401_v40, %v400_v39 }
  0x7d   :  { %618 = vmatmul.mubr.f32.vlgmr.msra.gmra.mrb[0].mxu0 %v101_v43  ;;  %796 = vmatpush3.bf16.msra.mxu1 %v795_v13  ;;  %v516_v43 = vld [vmem:[%s1218_s5 + $0x1] ss:$0 sm:$0xff] }
  0x7e   :  { %751 = vmatpush3.bf16.msra.mxu0 %v750_v44  ;;  %652 = vmatprep.mubr.msk.f32.mxu0 %vm1017_vm0, %v1018_v1 }
  0x7f   :  { %752 = vmatprep.subr.bf16.mxu0 %v1016_v0  ;;  %797 = vmatprep.subr.bf16.mxu1 %v1016_v0 }
  0x82   :  { %754 = vmatpush3.bf16.msra.mxu0 %v753_v47 }
  0x83   :  { %755 = vmatprep.subr.bf16.mxu0 %v1016_v0 }
  0x86   :  { %757 = vmatpush3.bf16.msra.mxu0 %v756_v50 }
  0x87   :  { %758 = vmatprep.subr.bf16.mxu0 %v1016_v0 }
  0x8a   :  { %760 = vmatpush3.bf16.msra.mxu0 %v759_v53 }
  0x8b   :  { %761 = vmatprep.subr.bf16.mxu0 %v1016_v0 }
  0x8e   :  { %763 = vmatpush3.bf16.msra.mxu0 %v762_v56 }
  0x8f   :  { %764 = vmatprep.subr.bf16.mxu0 %v1016_v0 }
  0x92   :  { %766 = vmatpush3.bf16.msra.mxu0 %v765_v59 }
  0x93   :  { %767 = vmatprep.subr.bf16.mxu0 %v1016_v0 }
  0x96   :  { %769 = vmatpush3.bf16.msra.mxu0 %v768_v62 }
  0x97   :  { %770 = vmatprep.subr.bf16.mxu0 %v1016_v0 }
  0x9a   :  { %772 = vmatpush3.bf16.msra.mxu0 %v771_v3 }
  0x9d   :  { %653 = vmatmul.mubr.f32.vlgmr.msra.gmra.mrb[0].mxu0 %v97_v4 }
 0x170   :  { %v280_v15 = vpop.f32.mrb[0].mxu0 }
 0x171   :  { %v821_v16 = vadd.f32 %v514_v14, %v280_v15  ;;  %v654_v17 = vpop.f32.mrb[1].mxu0 }
 0x173   :  { %841 = vtanh.f32 %v821_v16 }
 0x17d   :  { %v842_v23 = vpop.eup %841 }
 0x17e   :  { %288 = vst [vmem:[#allocation14] sm:$0xff] %v842_v23  ;;  %688 = vmatmul.mubr.f32.vlgmr.msra.gmra.mrb[0].mxu1 %v842_v23 }
 0x17f   :  { %799 = vmatpush3.bf16.msra.mxu1 %v798_v20  ;;  %722 = vmatprep.mubr.msk.f32.mxu1 %vm1017_vm0, %v1018_v1  ;;  %v396_v1 = vld [vmem:[#allocation12 + $0xd0] sm:$0xff] }
 0x180   :  { %800 = vmatprep.subr.bf16.mxu1 %v1016_v0  ;;  %v813_v35 = vpack.c.bf16 %v397_v34, %v396_v1 }
 0x183   :  { %802 = vmatpush3.bf16.msra.mxu1 %v801_v24 }
 0x184   :  { %803 = vmatprep.subr.bf16.mxu1 %v1016_v0 }
 0x187   :  { %805 = vmatpush3.bf16.msra.mxu1 %v804_v27 }
 0x188   :  { %806 = vmatprep.subr.bf16.mxu1 %v1016_v0 }
 0x18b   :  { %808 = vmatpush3.bf16.msra.mxu1 %v807_v30 }
 0x18c   :  { %809 = vmatprep.subr.bf16.mxu1 %v1016_v0 }
 0x18f   :  { %811 = vmatpush3.bf16.msra.mxu1 %v810_v33 }
 0x190   :  { %812 = vmatprep.subr.bf16.mxu1 %v1016_v0 }
 0x193   :  { %814 = vmatpush3.bf16.msra.mxu1 %v813_v35 }
 0x194   :  { %815 = vmatprep.subr.bf16.mxu1 %v1016_v0 }
 0x197   :  { %817 = vmatpush3.bf16.msra.mxu1 %v816_v38 }
 0x198   :  { %818 = vmatprep.subr.bf16.mxu1 %v1016_v0 }
 0x19b   :  { %820 = vmatpush3.bf16.msra.mxu1 %v819_v41 }
 0x19e   :  { %723 = vmatmul.mubr.f32.vlgmr.msra.gmra.mrb[0].mxu1 %v98_v42 }
 0x271   :  { %v471_v44 = vpop.f32.mrb[0].mxu1 }
 0x272   :  { %v824_v45 = vadd.f32 %v516_v43, %v471_v44  ;;  %v724_v46 = vpop.f32.mrb[1].mxu1 }
 0x274   :  { %843 = vtanh.f32 %v824_v45 }
 0x27e   :  { %v844_v47 = vpop.eup %843 }
 0x27f   :  { %477 = vst [vmem:[#allocation13] sm:$0xff] %v844_v47  ;;  %480 = vst [vmem:[#allocation14 + $0x8] sm:$0xff] %v844_v47 }
 0x280   :  { %966 = shalt.err (!%p963_p2)
}
 0x281   :  { %s967_s26 = scalar_lea.hbm %s1219_s6, 128 }
 0x282   :  { %p968_p3 = scmp.ne.s32.totalorder %s1219_s6, %s967_s26  ;;  %p971_p4 = scmp.lt.u32.totalorder %s967_s26, %s1219_s6 }
 0x284   :  { %p973_p5 = pnand %p971_p4, %p968_p3 }
 0x286   :  { %976 = shalt.err (!%p973_p5)
}
 0x287   :  { %490 = dma.vmem_to_hbm [thread:$0]  %s488_s20, 128, %s1219_s6, [#allocation6]  }
 0x288   :  { %s977_s29 = scalar_lea.vmem %s1179_s22, 256  ;;  %p982_p7 = scmp.lt.s32.totalorder %s1179_s22, %s1179_s22 }
 0x289   :  { %p978_p6 = scmp.ne.s32.totalorder %s1179_s22, %s977_s29  ;;  %p983_p8 = scmp.lt.s32.totalorder %s977_s29, %s977_s29 }
 0x28b   :  { %p984_p9 = por %p983_p8, %p982_p7 }
 0x28d   :  { %p985_p10 = pnand %p984_p9, %p978_p6 }
 0x28f   :  { %988 = shalt.err (!%p985_p10)
}
 0x290   :  { %s989_s9 = scalar_lea.hbm %s1220_s7, 256 }
 0x291   :  { %p990_p11 = scmp.ne.s32.totalorder %s1220_s7, %s989_s9  ;;  %p993_p12 = scmp.lt.u32.totalorder %s989_s9, %s1220_s7 }
 0x293   :  { %p995_p13 = pnand %p993_p12, %p990_p11 }
 0x295   :  { %998 = shalt.err (!%p995_p13)
}
 0x296   :  { %502 = dma.vmem_to_hbm [thread:$0]  %s1179_s22, 256, %s1220_s7, [#allocation15], %s1010_s11, %s1010_s11, %s1011_s12  }
 0x297   :  { %1005 = dma.done.wait [#allocation6], 128  }
 0x298   :  { %1006 = vsyncadd [#allocation6], 4294967168 }
 0x299   :  { %1007 = dma.done.wait [#allocation15], 256  }
 0x29a   :  { %1008 = vsyncadd [#allocation15], 4294967040 }
 0x29b   :  { %509 = vsyncpa [#allocation5], 1 }
 0x29c   :  { %510 = vsyncpa [#allocation8], 1 }
 0x29d   :  { %511 = vsyncpa [#allocation11], 1 }
 0x29e   :  { %512 = vsyncpa [#allocation6], 1 }
 0x29f   :  { %513 = vsyncpa [#allocation15], 1 }

// kernel: tpu_custom_call.1
= control target key start
LH: loop header
LB: loop body
LE: loop exit
PB: predicated region body
PF: predicated region fallthrough
CT: control target
= control target key end

     0   :  { %13 = vsyncpa [#allocation5], 0  ;;  %s1213_s0 = inlined_call_operand.hbm [shape: f32[1,8,128], index: 0, kind: input, shape index: {}]   ;;  %s1214_s1 = inlined_call_operand.hbm [shape: f32[2,8,128], index: 1, kind: input, shape index: {}]   ;;  %s1215_s2 = inlined_call_operand.hbm [shape: f32[128,128], index: 2, kind: input, shape index: {}]   ;;  %s1216_s3 = inlined_call_operand.hbm [shape: f32[1,128,128], index: 3, kind: input, shape index: {}]   ;;  %s1217_s4 = inlined_call_operand.hbm [shape: f32[2,128,128], index: 4, kind: input, shape index: {}]   ;;  %s1218_s5 = inlined_call_operand.vmem [shape: f32[2,1,128], index: 5, kind: input, shape index: {}]   ;;  %s1219_s6 = inlined_call_operand.hbm [shape: f32[1,8,128], index: 6, kind: output, shape index: {0}]   ;;  %s1220_s7 = inlined_call_operand.hbm [shape: f32[2,8,128], index: 7, kind: output, shape index: {1}]  }
   0x1   :  { %14 = vsyncpa [#allocation8], 0 }
   0x2   :  { %15 = vsyncpa [#allocation11], 0 }
   0x3   :  { %16 = vsyncpa [#allocation6], 0 }
   0x4   :  { %17 = vsyncpa [#allocation15], 0  ;;  %s1009_s24 = smov [#allocation7]   ;;  %s845_s28 = scalar_lea.hbm %s1214_s1, 256 }
   0x5   :  { %s33_s25 = sshll.u32 %s1009_s24, 4  ;;  %p846_p0 = scmp.ne.s32.totalorder %s1214_s1, %s845_s28  ;;  %s34_s25 = int_to_ptr.vmem [resolvable:$true] %s33_s25 }
   0x6   :  { %p849_p1 = scmp.lt.u32.totalorder %s845_s28, %s1214_s1 }
   0x8   :  { %p851_p2 = pnand %p849_p1, %p846_p0 }
   0xa   :  { %854 = shalt.err (!%p851_p2)
}
   0xb   :  { %s855_s10 = scalar_lea.vmem %s34_s25, 256  ;;  %p860_p4 = scmp.lt.s32.totalorder %s34_s25, %s34_s25 }
   0xc   :  { %p856_p3 = scmp.ne.s32.totalorder %s34_s25, %s855_s10  ;;  %p861_p5 = scmp.lt.s32.totalorder %s855_s10, %s855_s10 }
   0xe   :  { %p862_p6 = por %p861_p5, %p860_p4 }
  0x10   :  { %p863_p7 = pnand %p862_p6, %p856_p3 }
  0x12   :  { %866 = shalt.err (!%p863_p7)
}
  0x13   :  { %s1010_s11 = smov 128   ;;  %s1011_s12 = smov 8  }
  0x14   :  { %39 = dma.hbm_to_vmem [thread:$0]  %s1214_s1, 256, %s34_s25, [#allocation8], %s1010_s11, %s1010_s11, %s1011_s12  }
  0x15   :  { %s1012_s15 = smov [#allocation10]   ;;  %s1013_s17 = smov [#allocation4]  }
  0x16   :  { %s57_s16 = sshll.u32 %s1012_s15, 4  ;;  %s24_s18 = sshll.u32 %s1013_s17, 4  ;;  %s58_s16 = int_to_ptr.vmem [resolvable:$true] %s57_s16  ;;  %s25_s18 = int_to_ptr.vmem [resolvable:$true] %s24_s18 }
  0x17   :  { %s867_s21 = scalar_lea.hbm %s1216_s3, 2048 }
  0x18   :  { %p868_p8 = scmp.ne.s32.totalorder %s1216_s3, %s867_s21  ;;  %p871_p9 = scmp.lt.u32.totalorder %s867_s21, %s1216_s3 }
  0x1a   :  { %p873_p10 = pnand %p871_p9, %p868_p8 }
  0x1c   :  { %876 = shalt.err (!%p873_p10)
}
  0x1d   :  { %s877_s1 = scalar_lea.vmem %s58_s16, 2048  ;;  %p882_p12 = scmp.lt.s32.totalorder %s58_s16, %s58_s16 }
  0x1e   :  { %p878_p11 = scmp.ne.s32.totalorder %s58_s16, %s877_s1  ;;  %p883_p13 = scmp.lt.s32.totalorder %s877_s1, %s877_s1 }
  0x20   :  { %p884_p0 = por %p883_p13, %p882_p12 }
  0x22   :  { %p885_p1 = pnand %p884_p0, %p878_p11 }
  0x24   :  { %888 = shalt.err (!%p885_p1)
}
  0x25   :  { %63 = dma.hbm_to_vmem [thread:$0]  %s1216_s3, 2048, %s58_s16, [#allocation11], %s1010_s11, %s1010_s11, %s1011_s12  }
  0x26   :  { %s889_s30 = scalar_lea.hbm %s1213_s0, 128 }
  0x27   :  { %p890_p2 = scmp.ne.s32.totalorder %s1213_s0, %s889_s30  ;;  %p893_p3 = scmp.lt.u32.totalorder %s889_s30, %s1213_s0 }
  0x29   :  { %p895_p4 = pnand %p893_p3, %p890_p2 }
  0x2b   :  { %898 = shalt.err (!%p895_p4)
}
  0x2c   :  { %s899_s14 = scalar_lea.vmem %s25_s18, 128  ;;  %p904_p6 = scmp.lt.s32.totalorder %s25_s18, %s25_s18 }
  0x2d   :  { %p900_p5 = scmp.ne.s32.totalorder %s25_s18, %s899_s14  ;;  %p905_p7 = scmp.lt.s32.totalorder %s899_s14, %s899_s14 }
  0x2f   :  { %p906_p8 = por %p905_p7, %p904_p6 }
  0x31   :  { %p907_p9 = pnand %p906_p8, %p900_p5 }
  0x33   :  { %910 = shalt.err (!%p907_p9)
}
  0x34   :  { %27 = dma.hbm_to_vmem [thread:$0]  %s1213_s0, 128, %s25_s18, [#allocation5]  }
  0x35   :  { %s1014_s16 = smov [#allocation9]   ;;  %s1015_s19 = smov [#allocation12]  }
  0x36   :  { %s45_s17 = sshll.u32 %s1014_s16, 4  ;;  %s69_s20 = sshll.u32 %s1015_s19, 4  ;;  %s46_s17 = int_to_ptr.vmem [resolvable:$true] %s45_s17  ;;  %s70_s20 = int_to_ptr.vmem [resolvable:$true] %s69_s20 }
  0x37   :  { %s911_s23 = scalar_lea.hbm %s1215_s2, 2048 }
  0x38   :  { %p912_p10 = scmp.ne.s32.totalorder %s1215_s2, %s911_s23  ;;  %p915_p11 = scmp.lt.u32.totalorder %s911_s23, %s1215_s2 }
  0x3a   :  { %p917_p12 = pnand %p915_p11, %p912_p10 }
  0x3c   :  { %920 = shalt.err (!%p917_p12)
}
  0x3d   :  { %s921_s0 = scalar_lea.vmem %s46_s17, 2048  ;;  %p926_p0 = scmp.lt.s32.totalorder %s46_s17, %s46_s17 }
  0x3e   :  { %p922_p13 = scmp.ne.s32.totalorder %s46_s17, %s921_s0  ;;  %p927_p1 = scmp.lt.s32.totalorder %s921_s0, %s921_s0 }
  0x40   :  { %p928_p2 = por %p927_p1, %p926_p0 }
  0x42   :  { %p929_p3 = pnand %p928_p2, %p922_p13 }
  0x44   :  { %932 = shalt.err (!%p929_p3)
}
  0x45   :  { %51 = dma.hbm_to_vmem [thread:$0]  %s1215_s2, 2048, %s46_s17, [#allocation8], %s1010_s11, %s1010_s11, %s1011_s12  }
  0x46   :  { %s933_s30 = scalar_lea.hbm %s1217_s4, 4096 }
  0x47   :  { %p934_p4 = scmp.ne.s32.totalorder %s1217_s4, %s933_s30  ;;  %p937_p5 = scmp.lt.u32.totalorder %s933_s30, %s1217_s4 }
  0x49   :  { %p939_p6 = pnand %p937_p5, %p934_p4 }
  0x4b   :  { %942 = shalt.err (!%p939_p6)
}
  0x4c   :  { %s943_s14 = scalar_lea.vmem %s70_s20, 4096  ;;  %p948_p8 = scmp.lt.s32.totalorder %s70_s20, %s70_s20 }
  0x4d   :  { %p944_p7 = scmp.ne.s32.totalorder %s70_s20, %s943_s14  ;;  %p949_p9 = scmp.lt.s32.totalorder %s943_s14, %s943_s14 }
  0x4f   :  { %p950_p10 = por %p949_p9, %p948_p8 }
  0x51   :  { %p951_p11 = pnand %p950_p10, %p944_p7 }
  0x53   :  { %954 = shalt.err (!%p951_p11)
}
  0x54   :  { %75 = dma.hbm_to_vmem [thread:$0]  %s1217_s4, 4096, %s70_s20, [#allocation11], %s1010_s11, %s1010_s11, %s1011_s12  }
  0x55   :  { %999 = dma.done.wait [#allocation5], 128  }
  0x56   :  { %1000 = vsyncadd [#allocation5], 4294967168 }
  0x57   :  { %1001 = dma.done.wait [#allocation8], 2304  }
  0x58   :  { %1002 = vsyncadd [#allocation8], 4294964992 }
  0x59   :  { %1003 = dma.done.wait [#allocation11], 6144  }
  0x5a   :  { %1004 = vsyncadd [#allocation11], 4294961152  ;;  %v1016_v0 = vmov 0.0|0.0   ;;  %vm1017_vm0 = vmmov 0   ;;  %v1018_v1 = vmov 0.0   ;;  %v102_v2 = vld [vmem:[#allocation9] sm:$0xff] }
  0x5b   :  { %725 = vmatprep.subr.bf16.mxu0 %v1016_v0  ;;  %617 = vmatprep.mubr.msk.f32.mxu0 %vm1017_vm0, %v1018_v1  ;;  %v103_v3 = vld [vmem:[#allocation9 + $0x8] sm:$0xff]  ;;  %v104_v4 = vld [vmem:[#allocation9 + $0x10] sm:$0xff]  ;;  %v105_v6 = vld [vmem:[#allocation9 + $0x18] sm:$0xff]  ;;  %s1019_s19 = smov [#allocation13]   ;;  %s1020_s21 = smov [#allocation14]  }
  0x5c   :  { %773 = vmatprep.subr.bf16.mxu1 %v1016_v0  ;;  %687 = vmatprep.mubr.msk.f32.mxu1 %vm1017_vm0, %v1018_v1  ;;  %v726_v5 = vpack.c.bf16 %v103_v3, %v102_v2  ;;  %v729_v7 = vpack.c.bf16 %v105_v6, %v104_v4  ;;  %v106_v8 = vld [vmem:[#allocation9 + $0x20] sm:$0xff]  ;;  %v107_v9 = vld [vmem:[#allocation9 + $0x28] sm:$0xff]  ;;  %v108_v11 = vld [vmem:[#allocation9 + $0x30] sm:$0xff]  ;;  %s487_s20 = sshll.u32 %s1019_s19, 4  ;;  %s496_s22 = sshll.u32 %s1020_s21, 4  ;;  %s488_s20 = int_to_ptr.vmem [resolvable:$true] %s487_s20  ;;  %s1179_s22 = int_to_ptr.vmem [resolvable:$true] %s496_s22 }
  0x5d   :  { %v732_v10 = vpack.c.bf16 %v107_v9, %v106_v8  ;;  %v109_v12 = vld [vmem:[#allocation9 + $0x38] sm:$0xff]  ;;  %v110_v14 = vld [vmem:[#allocation9 + $0x40] sm:$0xff]  ;;  %v291_v16 = vld [vmem:[#allocation10 + $0x8] sm:$0xff]  ;;  %s955_s23 = scalar_lea.vmem %s488_s20, 128  ;;  %p960_p13 = scmp.lt.s32.totalorder %s488_s20, %s488_s20 }
  0x5e   :  { %727 = vmatpush3.bf16.msra.mxu0 %v726_v5  ;;  %v735_v13 = vpack.c.bf16 %v109_v12, %v108_v11  ;;  %v290_v15 = vld [vmem:[#allocation10] sm:$0xff]  ;;  %v111_v17 = vld [vmem:[#allocation9 + $0x48] sm:$0xff]  ;;  %v292_v19 = vld [vmem:[#allocation10 + $0x10] sm:$0xff]  ;;  %p956_p12 = scmp.ne.s32.totalorder %s488_s20, %s955_s23  ;;  %p961_p0 = scmp.lt.s32.totalorder %s955_s23, %s955_s23 }
  0x5f   :  { %728 = vmatprep.subr.bf16.mxu0 %v1016_v0  ;;  %v774_v18 = vpack.c.bf16 %v291_v16, %v290_v15  ;;  %v293_v20 = vld [vmem:[#allocation10 + $0x18] sm:$0xff]  ;;  %v738_v22 = vpack.c.bf16 %v111_v17, %v110_v14  ;;  %v294_v23 = vld [vmem:[#allocation10 + $0x20] sm:$0xff]  ;;  %v295_v24 = vld [vmem:[#allocation10 + $0x28] sm:$0xff] }
  0x60   :  { %v777_v21 = vpack.c.bf16 %v293_v20, %v292_v19  ;;  %v112_v25 = vld [vmem:[#allocation9 + $0x50] sm:$0xff]  ;;  %v113_v26 = vld [vmem:[#allocation9 + $0x58] sm:$0xff]  ;;  %v780_v27 = vpack.c.bf16 %v295_v24, %v294_v23  ;;  %v114_v31 = vld [vmem:[#allocation9 + $0x60] sm:$0xff]  ;;  %p962_p1 = por %p961_p0, %p960_p13 }
  0x61   :  { %775 = vmatpush3.bf16.msra.mxu1 %v774_v18  ;;  %v741_v28 = vpack.c.bf16 %v113_v26, %v112_v25  ;;  %v296_v29 = vld [vmem:[#allocation10 + $0x30] sm:$0xff]  ;;  %v297_v30 = vld [vmem:[#allocation10 + $0x38] sm:$0xff]  ;;  %v115_v32 = vld [vmem:[#allocation9 + $0x68] sm:$0xff] }
  0x62   :  { %730 = vmatpush3.bf16.msra.mxu0 %v729_v7  ;;  %776 = vmatprep.subr.bf16.mxu1 %v1016_v0  ;;  %v783_v33 = vpack.c.bf16 %v297_v30, %v296_v29  ;;  %v744_v34 = vpack.c.bf16 %v115_v32, %v114_v31  ;;  %v298_v35 = vld [vmem:[#allocation10 + $0x40] sm:$0xff]  ;;  %v299_v36 = vld [vmem:[#allocation10 + $0x48] sm:$0xff]  ;;  %v116_v37 = vld [vmem:[#allocation9 + $0x70] sm:$0xff]  ;;  %p963_p2 = pnand %p962_p1, %p956_p12 }
  0x63   :  { %731 = vmatprep.subr.bf16.mxu0 %v1016_v0  ;;  %v117_v38 = vld [vmem:[#allocation9 + $0x78] sm:$0xff]  ;;  %v786_v39 = vpack.c.bf16 %v299_v36, %v298_v35  ;;  %v196_v41 = vld [vmem:[#allocation12] sm:$0xff]  ;;  %v197_v42 = vld [vmem:[#allocation12 + $0x8] sm:$0xff] }
  0x64   :  { %v747_v40 = vpack.c.bf16 %v117_v38, %v116_v37  ;;  %v101_v43 = vld [vmem:[#allocation4] sm:$0xff]  ;;  %v750_v44 = vpack.c.bf16 %v197_v42, %v196_v41  ;;  %v198_v45 = vld [vmem:[#allocation12 + $0x10] sm:$0xff]  ;;  %v199_v46 = vld [vmem:[#allocation12 + $0x18] sm:$0xff] }
  0x65   :  { %778 = vmatpush3.bf16.msra.mxu1 %v777_v21  ;;  %v753_v47 = vpack.c.bf16 %v199_v46, %v198_v45  ;;  %v200_v48 = vld [vmem:[#allocation12 + $0x20] sm:$0xff]  ;;  %v201_v49 = vld [vmem:[#allocation12 + $0x28] sm:$0xff]  ;;  %v202_v51 = vld [vmem:[#allocation12 + $0x30] sm:$0xff] }
  0x66   :  { %733 = vmatpush3.bf16.msra.mxu0 %v732_v10  ;;  %779 = vmatprep.subr.bf16.mxu1 %v1016_v0  ;;  %v756_v50 = vpack.c.bf16 %v201_v49, %v200_v48  ;;  %v203_v52 = vld [vmem:[#allocation12 + $0x38] sm:$0xff]  ;;  %v204_v54 = vld [vmem:[#allocation12 + $0x40] sm:$0xff]  ;;  %v205_v55 = vld [vmem:[#allocation12 + $0x48] sm:$0xff] }
  0x67   :  { %734 = vmatprep.subr.bf16.mxu0 %v1016_v0  ;;  %v759_v53 = vpack.c.bf16 %v203_v52, %v202_v51  ;;  %v762_v56 = vpack.c.bf16 %v205_v55, %v204_v54  ;;  %v206_v57 = vld [vmem:[#allocation12 + $0x50] sm:$0xff]  ;;  %v207_v58 = vld [vmem:[#allocation12 + $0x58] sm:$0xff]  ;;  %v208_v60 = vld [vmem:[#allocation12 + $0x60] sm:$0xff] }
  0x68   :  { %v765_v59 = vpack.c.bf16 %v207_v58, %v206_v57  ;;  %v209_v61 = vld [vmem:[#allocation12 + $0x68] sm:$0xff]  ;;  %v210_v63 = vld [vmem:[#allocation12 + $0x70] sm:$0xff]  ;;  %v211_v2 = vld [vmem:[#allocation12 + $0x78] sm:$0xff] }
  0x69   :  { %781 = vmatpush3.bf16.msra.mxu1 %v780_v27  ;;  %v768_v62 = vpack.c.bf16 %v209_v61, %v208_v60  ;;  %v771_v3 = vpack.c.bf16 %v211_v2, %v210_v63  ;;  %v97_v4 = vld [vmem:[#allocation7] sm:$0xff]  ;;  %v301_v6 = vld [vmem:[#allocation10 + $0x58] sm:$0xff]  ;;  %v302_v8 = vld [vmem:[#allocation10 + $0x60] sm:$0xff] }
  0x6a   :  { %736 = vmatpush3.bf16.msra.mxu0 %v735_v13  ;;  %782 = vmatprep.subr.bf16.mxu1 %v1016_v0  ;;  %v300_v5 = vld [vmem:[#allocation10 + $0x50] sm:$0xff]  ;;  %v303_v9 = vld [vmem:[#allocation10 + $0x68] sm:$0xff]  ;;  %v305_v12 = vld [vmem:[#allocation10 + $0x78] sm:$0xff] }
  0x6b   :  { %737 = vmatprep.subr.bf16.mxu0 %v1016_v0  ;;  %v789_v7 = vpack.c.bf16 %v301_v6, %v300_v5  ;;  %v792_v10 = vpack.c.bf16 %v303_v9, %v302_v8  ;;  %v304_v11 = vld [vmem:[#allocation10 + $0x70] sm:$0xff]  ;;  %v514_v14 = vld [vmem:[%s1218_s5] ss:$0 sm:$0xff]  ;;  %v386_v18 = vld [vmem:[#allocation12 + $0x80] sm:$0xff] }
  0x6c   :  { %v795_v13 = vpack.c.bf16 %v305_v12, %v304_v11  ;;  %v387_v19 = vld [vmem:[#allocation12 + $0x88] sm:$0xff]  ;;  %v388_v21 = vld [vmem:[#allocation12 + $0x90] sm:$0xff]  ;;  %v390_v25 = vld [vmem:[#allocation12 + $0xa0] sm:$0xff] }
  0x6d   :  { %784 = vmatpush3.bf16.msra.mxu1 %v783_v33  ;;  %v798_v20 = vpack.c.bf16 %v387_v19, %v386_v18  ;;  %v391_v26 = vld [vmem:[#allocation12 + $0xa8] sm:$0xff]  ;;  %v393_v29 = vld [vmem:[#allocation12 + $0xb8] sm:$0xff]  ;;  %v394_v31 = vld [vmem:[#allocation12 + $0xc0] sm:$0xff] }
  0x6e   :  { %739 = vmatpush3.bf16.msra.mxu0 %v738_v22  ;;  %785 = vmatprep.subr.bf16.mxu1 %v1016_v0  ;;  %v389_v22 = vld [vmem:[#allocation12 + $0x98] sm:$0xff]  ;;  %v804_v27 = vpack.c.bf16 %v391_v26, %v390_v25  ;;  %v395_v32 = vld [vmem:[#allocation12 + $0xc8] sm:$0xff]  ;;  %v398_v36 = vld [vmem:[#allocation12 + $0xe0] sm:$0xff] }
  0x6f   :  { %740 = vmatprep.subr.bf16.mxu0 %v1016_v0  ;;  %v801_v24 = vpack.c.bf16 %v389_v22, %v388_v21  ;;  %v810_v33 = vpack.c.bf16 %v395_v32, %v394_v31  ;;  %v399_v37 = vld [vmem:[#allocation12 + $0xe8] sm:$0xff]  ;;  %v98_v42 = vld [vmem:[#allocation7 + $0x8] sm:$0xff] }
  0x70   :  { %v816_v38 = vpack.c.bf16 %v399_v37, %v398_v36 }
  0x71   :  { %787 = vmatpush3.bf16.msra.mxu1 %v786_v39  ;;  %v400_v39 = vld [vmem:[#allocation12 + $0xf0] sm:$0xff] }
  0x72   :  { %742 = vmatpush3.bf16.msra.mxu0 %v741_v28  ;;  %788 = vmatprep.subr.bf16.mxu1 %v1016_v0  ;;  %v392_v28 = vld [vmem:[#allocation12 + $0xb0] sm:$0xff] }
  0x73   :  { %743 = vmatprep.subr.bf16.mxu0 %v1016_v0  ;;  %v807_v30 = vpack.c.bf16 %v393_v29, %v392_v28 }
  0x75   :  { %790 = vmatpush3.bf16.msra.mxu1 %v789_v7 }
  0x76   :  { %745 = vmatpush3.bf16.msra.mxu0 %v744_v34  ;;  %791 = vmatprep.subr.bf16.mxu1 %v1016_v0  ;;  %v397_v34 = vld [vmem:[#allocation12 + $0xd8] sm:$0xff] }
  0x77   :  { %746 = vmatprep.subr.bf16.mxu0 %v1016_v0 }
  0x79   :  { %793 = vmatpush3.bf16.msra.mxu1 %v792_v10 }
  0x7a   :  { %748 = vmatpush3.bf16.msra.mxu0 %v747_v40  ;;  %794 = vmatprep.subr.bf16.mxu1 %v1016_v0  ;;  %v401_v40 = vld [vmem:[#allocation12 + $0xf8] sm:$0xff] }
  0x7b   :  { %749 = vmatprep.subr.bf16.mxu0 %v1016_v0  ;;  %v819_v41 = vpack.c.bf16 %v401_v40, %v400_v39 }
  0x7d   :  { %618 = vmatmul.mubr.f32.vlgmr.msra.gmra.mrb[0].mxu0 %v101_v43  ;;  %796 = vmatpush3.bf16.msra.mxu1 %v795_v13  ;;  %v516_v43 = vld [vmem:[%s1218_s5 + $0x1] ss:$0 sm:$0xff] }
  0x7e   :  { %751 = vmatpush3.bf16.msra.mxu0 %v750_v44  ;;  %652 = vmatprep.mubr.msk.f32.mxu0 %vm1017_vm0, %v1018_v1 }
  0x7f   :  { %752 = vmatprep.subr.bf16.mxu0 %v1016_v0  ;;  %797 = vmatprep.subr.bf16.mxu1 %v1016_v0 }
  0x82   :  { %754 = vmatpush3.bf16.msra.mxu0 %v753_v47 }
  0x83   :  { %755 = vmatprep.subr.bf16.mxu0 %v1016_v0 }
  0x86   :  { %757 = vmatpush3.bf16.msra.mxu0 %v756_v50 }
  0x87   :  { %758 = vmatprep.subr.bf16.mxu0 %v1016_v0 }
  0x8a   :  { %760 = vmatpush3.bf16.msra.mxu0 %v759_v53 }
  0x8b   :  { %761 = vmatprep.subr.bf16.mxu0 %v1016_v0 }
  0x8e   :  { %763 = vmatpush3.bf16.msra.mxu0 %v762_v56 }
  0x8f   :  { %764 = vmatprep.subr.bf16.mxu0 %v1016_v0 }
  0x92   :  { %766 = vmatpush3.bf16.msra.mxu0 %v765_v59 }
  0x93   :  { %767 = vmatprep.subr.bf16.mxu0 %v1016_v0 }
  0x96   :  { %769 = vmatpush3.bf16.msra.mxu0 %v768_v62 }
  0x97   :  { %770 = vmatprep.subr.bf16.mxu0 %v1016_v0 }
  0x9a   :  { %772 = vmatpush3.bf16.msra.mxu0 %v771_v3 }
  0x9d   :  { %653 = vmatmul.mubr.f32.vlgmr.msra.gmra.mrb[0].mxu0 %v97_v4 }
 0x170   :  { %v280_v15 = vpop.f32.mrb[0].mxu0 }
 0x171   :  { %v821_v16 = vadd.f32 %v514_v14, %v280_v15  ;;  %v654_v17 = vpop.f32.mrb[1].mxu0 }
 0x173   :  { %841 = vtanh.f32 %v821_v16 }
 0x17d   :  { %v842_v23 = vpop.eup %841 }
 0x17e   :  { %288 = vst [vmem:[#allocation14] sm:$0xff] %v842_v23  ;;  %688 = vmatmul.mubr.f32.vlgmr.msra.gmra.mrb[0].mxu1 %v842_v23 }
 0x17f   :  { %799 = vmatpush3.bf16.msra.mxu1 %v798_v20  ;;  %722 = vmatprep.mubr.msk.f32.mxu1 %vm1017_vm0, %v1018_v1  ;;  %v396_v1 = vld [vmem:[#allocation12 + $0xd0] sm:$0xff] }
 0x180   :  { %800 = vmatprep.subr.bf16.mxu1 %v1016_v0  ;;  %v813_v35 = vpack.c.bf16 %v397_v34, %v396_v1 }
 0x183   :  { %802 = vmatpush3.bf16.msra.mxu1 %v801_v24 }
 0x184   :  { %803 = vmatprep.subr.bf16.mxu1 %v1016_v0 }
 0x187   :  { %805 = vmatpush3.bf16.msra.mxu1 %v804_v27 }
 0x188   :  { %806 = vmatprep.subr.bf16.mxu1 %v1016_v0 }
 0x18b   :  { %808 = vmatpush3.bf16.msra.mxu1 %v807_v30 }
 0x18c   :  { %809 = vmatprep.subr.bf16.mxu1 %v1016_v0 }
 0x18f   :  { %811 = vmatpush3.bf16.msra.mxu1 %v810_v33 }
 0x190   :  { %812 = vmatprep.subr.bf16.mxu1 %v1016_v0 }
 0x193   :  { %814 = vmatpush3.bf16.msra.mxu1 %v813_v35 }
 0x194   :  { %815 = vmatprep.subr.bf16.mxu1 %v1016_v0 }
 0x197   :  { %817 = vmatpush3.bf16.msra.mxu1 %v816_v38 }
 0x198   :  { %818 = vmatprep.subr.bf16.mxu1 %v1016_v0 }
 0x19b   :  { %820 = vmatpush3.bf16.msra.mxu1 %v819_v41 }
 0x19e   :  { %723 = vmatmul.mubr.f32.vlgmr.msra.gmra.mrb[0].mxu1 %v98_v42 }
 0x271   :  { %v471_v44 = vpop.f32.mrb[0].mxu1 }
 0x272   :  { %v824_v45 = vadd.f32 %v516_v43, %v471_v44  ;;  %v724_v46 = vpop.f32.mrb[1].mxu1 }
 0x274   :  { %843 = vtanh.f32 %v824_v45 }
 0x27e   :  { %v844_v47 = vpop.eup %843 }
 0x27f   :  { %477 = vst [vmem:[#allocation13] sm:$0xff] %v844_v47  ;;  %480 = vst [vmem:[#allocation14 + $0x8] sm:$0xff] %v844_v47 }
 0x280   :  { %966 = shalt.err (!%p963_p2)
}
 0x281   :  { %s967_s26 = scalar_lea.hbm %s1219_s6, 128 }
 0x282   :  { %p968_p3 = scmp.ne.s32.totalorder %s1219_s6, %s967_s26  ;;  %p971_p4 = scmp.lt.u32.totalorder %s967_s26, %s1219_s6 }
 0x284   :  { %p973_p5 = pnand %p971_p4, %p968_p3 }
 0x286   :  { %976 = shalt.err (!%p973_p5)
}
 0x287   :  { %490 = dma.vmem_to_hbm [thread:$0]  %s488_s20, 128, %s1219_s6, [#allocation6]  }
 0x288   :  { %s977_s29 = scalar_lea.vmem %s1179_s22, 256  ;;  %p982_p7 = scmp.lt.s32.totalorder %s1179_s22, %s1179_s22 }
 0x289   :  { %p978_p6 = scmp.ne.s32.totalorder %s1179_s22, %s977_s29  ;;  %p983_p8 = scmp.lt.s32.totalorder %s977_s29, %s977_s29 }
 0x28b   :  { %p984_p9 = por %p983_p8, %p982_p7 }
 0x28d   :  { %p985_p10 = pnand %p984_p9, %p978_p6 }
 0x28f   :  { %988 = shalt.err (!%p985_p10)
}
 0x290   :  { %s989_s9 = scalar_lea.hbm %s1220_s7, 256 }
 0x291   :  { %p990_p11 = scmp.ne.s32.totalorder %s1220_s7, %s989_s9  ;;  %p993_p12 = scmp.lt.u32.totalorder %s989_s9, %s1220_s7 }
 0x293   :  { %p995_p13 = pnand %p993_p12, %p990_p11 }
 0x295   :  { %998 = shalt.err (!%p995_p13)
}
 0x296   :  { %502 = dma.vmem_to_hbm [thread:$0]  %s1179_s22, 256, %s1220_s7, [#allocation15], %s1010_s11, %s1010_s11, %s1011_s12  }
 0x297   :  { %1005 = dma.done.wait [#allocation6], 128  }
 0x298   :  { %1006 = vsyncadd [#allocation6], 4294967168 }
 0x299   :  { %1007 = dma.done.wait [#allocation15], 256  }
 0x29a   :  { %1008 = vsyncadd [#allocation15], 4294967040 }
 0x29b   :  { %509 = vsyncpa [#allocation5], 1 }
 0x29c   :  { %510 = vsyncpa [#allocation8], 1 }
 0x29d   :  { %511 = vsyncpa [#allocation11], 1 }
 0x29e   :  { %512 = vsyncpa [#allocation6], 1 }
 0x29f   :  { %513 = vsyncpa [#allocation15], 1 }

</bundles_post_ra>
